<compile_context>
chip_gen: v7x
topology: tpu7x:2x2x1
jax: 0.10.0
libtpu: 0.0.40
codegen_flags: <defaults>
</compile_context>

<pallas_src>
import functools
import math

import jax
import jax.numpy as jnp
from jax import lax
from jax.experimental import pallas as pl
from jax.experimental.pallas import tpu as pltpu

VMEM = pltpu.MemorySpace.VMEM
LANES = 128
NT_DIMS = (((1,), (1,)), ((), ()))  # A @ B^T without materializing B^T


def _vspec():
    return pl.BlockSpec(memory_space=VMEM)


# ----------------------------------------------------------------------------
# Single fused kernel: whole forward pass after embedding gather / pooling
# ----------------------------------------------------------------------------
def _hyperbridge_kernel(
    enc_ref,        # (B, 204)   [img_flat | signals]
    emb_ref,        # (T*B, E)   time-major flattened embeddings
    slab_ref,       # (R, 128)   packed parameters
    logits_ref,     # (B, 128)   lane-padded logits
    loss_ref,       # (1, 128)   lane-dense scalar loss row
    *, layout, th, cheb_k, top_k, threshold,
):
    def blk(name):
        r0, nr, nc = layout[name]
        return slab_ref[r0:r0 + nr, 0:nc]

    B = enc_ref.shape[0]

    # ---------------- fused image + signal encoders (block-diag layer 1) -----
    enc_h = jnp.maximum(
        jnp.dot(enc_ref[...], blk("enc_w1"),
                preferred_element_type=jnp.float32) + blk("enc_b1"), 0.0)

    # ---------------- text encoder: LSTM + mean over T -----------------------
    # Input projection hoisted out of the recurrence: one (T*B,E)x(E,4H) matmul.
    # Gate columns are pre-ordered (i, f, o | g): 1 sigmoid + 1 tanh per step.
    gates_x = jnp.dot(emb_ref[...], blk("wih"),
                      preferred_element_type=jnp.float32) + blk("lstm_b")
    T = emb_ref.shape[0] // B
    whh = blk("whh")
    h_t = jnp.zeros((B, th), jnp.float32)
    c_t = jnp.zeros((B, th), jnp.float32)
    acc = jnp.zeros((B, th), jnp.float32)
    for t in range(T):  # static unroll: only h @ W_hh stays on the serial path
        # TODO(synk): on v5e the per-step MXU matmul could become a VPU
        # broadcast-FMA (or staged-RHS MXU) to shorten the serial recurrence.
        gates = gates_x[t * B:(t + 1) * B, :] + jnp.dot(
            h_t, whh, preferred_element_type=jnp.float32)
        sg = jax.nn.sigmoid(gates[:, :3 * th])   # i | f | o  (one EUP push)
        gg = jnp.tanh(gates[:, 3 * th:])         # g          (one EUP push)
        c_t = sg[:, th:2 * th] * c_t + sg[:, :th] * gg
        h_t = sg[:, 2 * th:3 * th] * jnp.tanh(c_t)
        acc = acc + h_t
    text_h = acc * (1.0 / float(T))              # lstm_out.mean(dim=1)

    # ---------------- fused output projections -> node_features --------------
    # proj_w is block-diagonal (img_w2 / txt_w / sig_w2) so the single matmul
    # directly produces [img_feat | text_feat | sig_feat].
    pre = jnp.concatenate([enc_h, text_h], axis=1)            # (B, 2*hd + th)
    node_features = jnp.dot(pre, blk("proj_w"),
                            preferred_element_type=jnp.float32) + blk("proj_b")

    # ---------------- hyperedge generation -----------------------------------
    # TODO(synk): HybridHyperedgeGenerator source not provided; standard
    # learned-prototype generator (sigmoid affinities, per-node top_k+threshold
    # masking, edge weights = mean affinity per edge).
    a = jax.nn.sigmoid(
        jnp.dot(node_features, blk("hg_wp"),
                preferred_element_type=jnp.float32) + blk("hg_bp"))
    work = a
    kth = jnp.max(work, axis=1, keepdims=True)
    for _ in range(top_k - 1):                                # static top_k
        work = jnp.where(work >= kth, -jnp.inf, work)
        kth = jnp.max(work, axis=1, keepdims=True)
    keep = (a >= kth) & (a > threshold)
    Hm = jnp.where(keep, a, 0.0)                              # incidence (N, E)
    ew = jnp.mean(a, axis=0, keepdims=True)                   # edge weights (1, E)

    # ---------------- normalized hypergraph Laplacian ------------------------
    # theta = H De^{-1} H^T computed once; shared with the regularizer below.
    de = jnp.sum(Hm, axis=0, keepdims=True) + 1e-8            # (1, E)
    de_inv = pl.reciprocal(de, approx=True)
    theta = lax.dot_general(Hm * de_inv, Hm, NT_DIMS,
                            preferred_element_type=jnp.float32)   # (N, N)
    dv = jnp.sum(Hm * ew, axis=1) + 1e-8                      # weighted degrees
    dv_is = lax.rsqrt(dv)
    # L = I - Dv^-1/2 theta Dv^-1/2 ; Chebyshev rescaling L_hat = L - I = -W
    # (no identity matrix materialized, no subtractions).
    L_hat = -(dv_is[:, None] * theta * dv_is[None, :])

    # TODO(synk): WaveletChebConv source not provided; Chebyshev recursion with
    # heat-kernel damping exp(-tau*k) (pre-folded into theta) and lambda_max~=2
    # rescaling.  K output projections fused into a single matmul.
    def cheb(x_in, theta_stack, b_row):
        ts = [x_in]
        for k in range(1, cheb_k):
            if k == 1:
                ts.append(jnp.dot(L_hat, x_in, preferred_element_type=jnp.float32))
            else:
                ts.append(2.0 * jnp.dot(L_hat, ts[-1],
                                        preferred_element_type=jnp.float32) - ts[-2])
        tx = jnp.concatenate(ts, axis=1)                      # (B, K*in)
        return jnp.dot(tx, theta_stack,
                       preferred_element_type=jnp.float32) + b_row

    x1 = jnp.maximum(cheb(node_features, blk("cheb1"), blk("cheb1_b")), 0.0)
    x2 = jnp.maximum(cheb(x1, blk("cheb2"), blk("cheb2_b")), 0.0)

    # ---------------- classifier (lane-dense final store) --------------------
    hc = jnp.maximum(
        jnp.dot(x2, blk("cls_w1"),
                preferred_element_type=jnp.float32) + blk("cls_b1"), 0.0)
    logits_ref[...] = jnp.dot(hc, blk("cls_w2"),
                              preferred_element_type=jnp.float32) + blk("cls_b2")

    # ---------------- spectral-cut (Rayleigh) regularizer --------------------
    # TODO(synk): SpectralCutRegularizer source not provided; Rayleigh-quotient
    # form mean_j (x^T (Dv - theta) x)_j / (x^T Dv x)_j with the unweighted
    # degrees from _compute_degree_matrices (theta reused from above).
    dv_r = jnp.sum(Hm, axis=1) + 1e-8
    lc_x2 = dv_r[:, None] * x2 - jnp.dot(theta, x2,
                                         preferred_element_type=jnp.float32)
    num = jnp.sum(x2 * lc_x2, axis=0, keepdims=True)
    den = jnp.sum(dv_r[:, None] * x2 * x2, axis=0, keepdims=True) + 1e-8
    loss = jnp.mean(num * pl.reciprocal(den, approx=True))
    loss_ref[...] = jnp.full(loss_ref.shape, loss, jnp.float32)   # lane-dense row


# ----------------------------------------------------------------------------
# Parameter construction (deterministic, synthetic)
# ----------------------------------------------------------------------------
def init_params(cfg, key):
    ks = iter(jax.random.split(key, 32))
    hd = cfg["hidden_dim"]

    def w(shape, scale=0.1):
        return (scale * jax.random.normal(next(ks), shape)).astype(jnp.float32)

    p = {}
    # image encoder: Linear(192, hd) -> ReLU -> Linear(hd, hd)
    p["img_w1"], p["img_b1"] = w((192, hd)), w((hd,))
    p["img_w2"], p["img_b2"] = w((hd, hd)), w((hd,))
    # text encoder: Embedding, LSTM(embed -> text_hidden), Linear(text_hidden, hd)
    p["emb"] = w((cfg["vocab_size"], cfg["embed_dim"]), 1.0)
    th = cfg["text_hidden"]
    p["lstm_wih_t"] = w((cfg["embed_dim"], 4 * th))   # transposed weight_ih
    p["lstm_whh_t"] = w((th, 4 * th))                 # transposed weight_hh
    p["lstm_b"] = w((4 * th,)) + w((4 * th,))         # b_ih + b_hh combined
    p["txt_w"], p["txt_b"] = w((th, hd)), w((hd,))
    # signal encoder
    p["sig_w1"], p["sig_b1"] = w((cfg["signal_dim"], hd)), w((hd,))
    p["sig_w2"], p["sig_b2"] = w((hd, hd)), w((hd,))
    # hypergraph generator (edge prototypes)
    p["hg_wp"] = w((3 * hd, cfg["n_edges"]))
    p["hg_bp"] = w((cfg["n_edges"],))
    # wavelet Chebyshev convs
    K = cfg["cheb_k"]
    p["cheb1_th"] = w((K, 3 * hd, hd))
    p["cheb1_b"] = w((hd,))
    p["cheb2_th"] = w((K, hd, hd // 2))
    p["cheb2_b"] = w((hd // 2,))
    # classifier: Linear(hd//2, hd//4) -> ReLU -> Linear(hd//4, n_classes)
    p["cls_w1"], p["cls_b1"] = w((hd // 2, hd // 4)), w((hd // 4,))
    p["cls_w2"], p["cls_b2"] = w((hd // 4, cfg["n_classes"])), w((cfg["n_classes"],))
    return p


# ----------------------------------------------------------------------------
# Parameter packing: fold / fuse / reorder, then pack into one (R, 128) slab
# ----------------------------------------------------------------------------
def pack_params(params, cfg):
    hd, th, K = cfg["hidden_dim"], cfg["text_hidden"], cfg["cheb_k"]
    tau = float(cfg["tau"])

    # image+signal layer-1 block diagonal: (192+12, 2*hd)
    d_img, d_sig = params["img_w1"].shape[0], params["sig_w1"].shape[0]
    enc_w1 = jnp.zeros((d_img + d_sig, 2 * hd), jnp.float32)
    enc_w1 = enc_w1.at[:d_img, :hd].set(params["img_w1"])
    enc_w1 = enc_w1.at[d_img:, hd:].set(params["sig_w1"])
    enc_b1 = jnp.concatenate([params["img_b1"], params["sig_b1"]])

    # fused output projections: rows [img_h | sig_h | text_h] -> cols
    # [img_feat | text_feat | sig_feat]  (block structure)
    proj_w = jnp.zeros((2 * hd + th, 3 * hd), jnp.float32)
    proj_w = proj_w.at[0:hd, 0:hd].set(params["img_w2"])
    proj_w = proj_w.at[hd:2 * hd, 2 * hd:3 * hd].set(params["sig_w2"])
    proj_w = proj_w.at[2 * hd:2 * hd + th, hd:2 * hd].set(params["txt_w"])
    proj_b = jnp.concatenate([params["img_b2"], params["txt_b"], params["sig_b2"]])

    # LSTM gate reorder (i, f, g, o) -> (i, f, o, g)
    def reorder(x):
        return jnp.concatenate(
            [x[..., :2 * th], x[..., 3 * th:4 * th], x[..., 2 * th:3 * th]], axis=-1)

    wih = reorder(params["lstm_wih_t"])
    whh = reorder(params["lstm_whh_t"])
    lstm_b = reorder(params["lstm_b"])

    # Chebyshev: pre-fold heat-kernel scales exp(-tau*k) and stack along input
    scales = jnp.asarray([math.exp(-tau * k) for k in range(K)], jnp.float32)
    cheb1 = (params["cheb1_th"] * scales[:, None, None]).reshape(K * 3 * hd, hd)
    cheb2 = (params["cheb2_th"] * scales[:, None, None]).reshape(K * hd, hd // 2)

    # classifier final layer lane-padded to 128 output lanes
    pad = LANES - params["cls_w2"].shape[1]
    cls_w2 = jnp.pad(params["cls_w2"], ((0, 0), (0, pad)))
    cls_b2 = jnp.pad(params["cls_b2"], ((0, pad),))

    blocks = [
        ("enc_w1", enc_w1), ("enc_b1", enc_b1.reshape(1, -1)),
        ("wih", wih), ("whh", whh), ("lstm_b", lstm_b.reshape(1, -1)),
        ("proj_w", proj_w), ("proj_b", proj_b.reshape(1, -1)),
        ("hg_wp", params["hg_wp"]), ("hg_bp", params["hg_bp"].reshape(1, -1)),
        ("cheb1", cheb1), ("cheb1_b", params["cheb1_b"].reshape(1, -1)),
        ("cheb2", cheb2), ("cheb2_b", params["cheb2_b"].reshape(1, -1)),
        ("cls_w1", params["cls_w1"]), ("cls_b1", params["cls_b1"].reshape(1, -1)),
        ("cls_w2", cls_w2), ("cls_b2", cls_b2.reshape(1, -1)),
    ]

    layout = {}
    parts = []
    r = 0
    for name, arr in blocks:
        arr = jnp.asarray(arr, jnp.float32)
        nr, nc = arr.shape
        layout[name] = (r, nr, nc)
        pad_r = (-nr) % 8                         # 8-row (sublane) alignment
        parts.append(jnp.pad(arr, ((0, pad_r), (0, LANES - nc))))
        r += nr + pad_r
    slab = jnp.concatenate(parts, axis=0)         # one lane-dense (R, 128) DMA
    return slab, layout


# ----------------------------------------------------------------------------
# Full forward pass: JAX glue (pool + embedding gather + packing) + one kernel
# ----------------------------------------------------------------------------
def hyperbridge_forward(params, cfg, images, text, signals):
    B, C, Hi, Wi = images.shape
    n_classes = cfg["n_classes"]

    # AdaptiveAvgPool2d((8,8)) + Flatten (exact match for H, W divisible by 8)
    pooled = images.reshape(B, C, 8, Hi // 8, 8, Wi // 8).mean(axis=(3, 5))
    img_flat = pooled.reshape(B, C * 64).astype(jnp.float32)           # (B, 192)
    enc_in = jnp.concatenate([img_flat, signals.astype(jnp.float32)], axis=1)

    # Embedding lookup (gather) kept as glue; time-major flatten so the LSTM
    # input projection is one big matmul inside the kernel.
    T = text.shape[1]
    emb = params["emb"][text]                                          # (B, T, E)
    emb_tb = jnp.transpose(emb, (1, 0, 2)).reshape(T * B, -1).astype(jnp.float32)

    slab, layout = pack_params(params, cfg)

    kernel = functools.partial(
        _hyperbridge_kernel,
        layout=layout,
        th=int(cfg["text_hidden"]),
        cheb_k=int(cfg["cheb_k"]),
        top_k=int(cfg["top_k"]),
        threshold=float(cfg["threshold"]),
    )
    logits_pad, loss_row = pl.pallas_call(
        kernel,
        out_shape=(jax.ShapeDtypeStruct((B, LANES), jnp.float32),
                   jax.ShapeDtypeStruct((1, LANES), jnp.float32)),
        in_specs=[_vspec(), _vspec(), _vspec()],
        out_specs=(_vspec(), _vspec()),
    )(enc_in, emb_tb, slab)
    return logits_pad[:, :n_classes], loss_row[0, 0]


# ----------------------------------------------------------------------------
if __name__ == "__main__":
    cfg = {
        "hidden_dim": 32,
        "vocab_size": 50,
        "embed_dim": 16,
        "text_hidden": 16,
        "signal_dim": 12,
        "top_k": 3,
        "threshold": 0.2,
        "cheb_k": 3,
        "tau": 0.5,
        "n_classes": 5,
        "n_edges": 8,
    }
    B, T = 4, 8

    key = jax.random.PRNGKey(0)
    k_img, k_txt, k_sig, _ = jax.random.split(key, 4)
    images = jax.random.normal(k_img, (B, 3, 16, 16), dtype=jnp.float32)
    text = jax.random.randint(k_txt, (B, T), 0, cfg["vocab_size"], dtype=jnp.int32)
    signals = jax.random.normal(k_sig, (B, cfg["signal_dim"]), dtype=jnp.float32)

    params = init_params(cfg, jax.random.PRNGKey(42))

    fwd = jax.jit(lambda p, im, tx, sg: hyperbridge_forward(p, cfg, im, tx, sg))
    logits, pruning_loss = fwd(params, images, text, signals)
    jax.block_until_ready((logits, pruning_loss))

    assert logits.shape == (B, cfg["n_classes"])
    assert pruning_loss.shape == ()
    assert bool(jnp.all(jnp.isfinite(logits))) and bool(jnp.isfinite(pruning_loss))
    print("KERNEL_OK")
</pallas_src>

<mosaic_0001>
module attributes {stable_mosaic.version = 11 : i64} {
  func.func @_hyperbridge_kernel(%arg0: memref<4x204xf32, #tpu.memory_space<vmem>>, %arg1: memref<32x16xf32, #tpu.memory_space<vmem>>, %arg2: memref<888x128xf32, #tpu.memory_space<vmem>>, %arg3: memref<4x128xf32, #tpu.memory_space<vmem>>, %arg4: memref<1x128xf32, #tpu.memory_space<vmem>>) attributes {dimension_semantics = [], scalar_prefetch = 0 : i64, scratch_operands = 0 : i64, tpu.core_type = #tpu.core_type<tc>} {
    %c0 = arith.constant 0 : index
    %c0_0 = arith.constant 0 : index
    %0 = vector.load %arg0[%c0, %c0_0] : memref<4x204xf32, #tpu.memory_space<vmem>>, vector<4x204xf32>
    %c0_1 = arith.constant 0 : index
    %c0_2 = arith.constant 0 : index
    %1 = vector.load %arg2[%c0_1, %c0_2] : memref<888x128xf32, #tpu.memory_space<vmem>>, vector<204x64xf32>
    %cst = arith.constant dense<0.000000e+00> : vector<4x64xf32>
    %2 = tpu.matmul %0, %1, %cst {dimension_numbers = #tpu.dot_dimension_numbers<[1], [0], [0], [1], [0, 0, 1, 1], [], []>} : vector<4x204xf32>, vector<204x64xf32>, vector<4x64xf32> -> vector<4x64xf32>
    %c208 = arith.constant 208 : index
    %c0_3 = arith.constant 0 : index
    %3 = vector.load %arg2[%c208, %c0_3] : memref<888x128xf32, #tpu.memory_space<vmem>>, vector<1x64xf32>
    %4 = vector.broadcast %3 : vector<1x64xf32> to vector<4x64xf32>
    %5 = arith.addf %2, %4 : vector<4x64xf32>
    %cst_4 = arith.constant 0.000000e+00 : f32
    %6 = vector.broadcast %cst_4 : f32 to vector<4x64xf32>
    %7 = arith.maximumf %5, %6 : vector<4x64xf32>
    %c0_5 = arith.constant 0 : index
    %c0_6 = arith.constant 0 : index
    %8 = vector.load %arg1[%c0_5, %c0_6] : memref<32x16xf32, #tpu.memory_space<vmem>>, vector<32x16xf32>
    %c216 = arith.constant 216 : index
    %c0_7 = arith.constant 0 : index
    %9 = vector.load %arg2[%c216, %c0_7] : memref<888x128xf32, #tpu.memory_space<vmem>>, vector<16x64xf32>
    %cst_8 = arith.constant dense<0.000000e+00> : vector<32x64xf32>
    %10 = tpu.matmul %8, %9, %cst_8 {dimension_numbers = #tpu.dot_dimension_numbers<[1], [0], [0], [1], [0, 0, 1, 1], [], []>} : vector<32x16xf32>, vector<16x64xf32>, vector<32x64xf32> -> vector<32x64xf32>
    %c248 = arith.constant 248 : index
    %c0_9 = arith.constant 0 : index
    %11 = vector.load %arg2[%c248, %c0_9] : memref<888x128xf32, #tpu.memory_space<vmem>>, vector<1x64xf32>
    %12 = vector.broadcast %11 : vector<1x64xf32> to vector<32x64xf32>
    %13 = arith.addf %10, %12 : vector<32x64xf32>
    %c232 = arith.constant 232 : index
    %c0_10 = arith.constant 0 : index
    %14 = vector.load %arg2[%c232, %c0_10] : memref<888x128xf32, #tpu.memory_space<vmem>>, vector<16x64xf32>
    %cst_11 = arith.constant 0.000000e+00 : f32
    %15 = vector.broadcast %cst_11 : f32 to vector<4x16xf32>
    %cst_12 = arith.constant 0.000000e+00 : f32
    %16 = vector.broadcast %cst_12 : f32 to vector<4x16xf32>
    %cst_13 = arith.constant 0.000000e+00 : f32
    %17 = vector.broadcast %cst_13 : f32 to vector<4x16xf32>
    %18 = vector.extract_strided_slice %13 {offsets = [0, 0], sizes = [4, 64], strides = [1, 1]} : vector<32x64xf32> to vector<4x64xf32>
    %cst_14 = arith.constant dense<0.000000e+00> : vector<4x64xf32>
    %19 = tpu.matmul %15, %14, %cst_14 {dimension_numbers = #tpu.dot_dimension_numbers<[1], [0], [0], [1], [0, 0, 1, 1], [], []>} : vector<4x16xf32>, vector<16x64xf32>, vector<4x64xf32> -> vector<4x64xf32>
    %20 = arith.addf %18, %19 : vector<4x64xf32>
    %21 = vector.extract_strided_slice %20 {offsets = [0, 0], sizes = [4, 48], strides = [1, 1]} : vector<4x64xf32> to vector<4x48xf32>
    %22 = arith.negf %21 : vector<4x48xf32>
    %23 = math.exp %22 : vector<4x48xf32>
    %cst_15 = arith.constant 1.000000e+00 : f32
    %24 = vector.broadcast %cst_15 : f32 to vector<4x48xf32>
    %25 = arith.addf %24, %23 : vector<4x48xf32>
    %26 = arith.divf %24, %25 : vector<4x48xf32>
    %27 = vector.extract_strided_slice %20 {offsets = [0, 48], sizes = [4, 16], strides = [1, 1]} : vector<4x64xf32> to vector<4x16xf32>
    %28 = math.tanh %27 : vector<4x16xf32>
    %29 = vector.extract_strided_slice %26 {offsets = [0, 16], sizes = [4, 16], strides = [1, 1]} : vector<4x48xf32> to vector<4x16xf32>
    %30 = arith.mulf %29, %16 : vector<4x16xf32>
    %31 = vector.extract_strided_slice %26 {offsets = [0, 0], sizes = [4, 16], strides = [1, 1]} : vector<4x48xf32> to vector<4x16xf32>
    %32 = arith.mulf %31, %28 : vector<4x16xf32>
    %33 = arith.addf %30, %32 : vector<4x16xf32>
    %34 = vector.extract_strided_slice %26 {offsets = [0, 32], sizes = [4, 16], strides = [1, 1]} : vector<4x48xf32> to vector<4x16xf32>
    %35 = math.tanh %33 : vector<4x16xf32>
    %36 = arith.mulf %34, %35 : vector<4x16xf32>
    %37 = arith.addf %17, %36 : vector<4x16xf32>
    %38 = vector.extract_strided_slice %13 {offsets = [4, 0], sizes = [4, 64], strides = [1, 1]} : vector<32x64xf32> to vector<4x64xf32>
    %cst_16 = arith.constant dense<0.000000e+00> : vector<4x64xf32>
    %39 = tpu.matmul %36, %14, %cst_16 {dimension_numbers = #tpu.dot_dimension_numbers<[1], [0], [0], [1], [0, 0, 1, 1], [], []>} : vector<4x16xf32>, vector<16x64xf32>, vector<4x64xf32> -> vector<4x64xf32>
    %40 = arith.addf %38, %39 : vector<4x64xf32>
    %41 = vector.extract_strided_slice %40 {offsets = [0, 0], sizes = [4, 48], strides = [1, 1]} : vector<4x64xf32> to vector<4x48xf32>
    %42 = arith.negf %41 : vector<4x48xf32>
    %43 = math.exp %42 : vector<4x48xf32>
    %cst_17 = arith.constant 1.000000e+00 : f32
    %44 = vector.broadcast %cst_17 : f32 to vector<4x48xf32>
    %45 = arith.addf %44, %43 : vector<4x48xf32>
    %46 = arith.divf %44, %45 : vector<4x48xf32>
    %47 = vector.extract_strided_slice %40 {offsets = [0, 48], sizes = [4, 16], strides = [1, 1]} : vector<4x64xf32> to vector<4x16xf32>
    %48 = math.tanh %47 : vector<4x16xf32>
    %49 = vector.extract_strided_slice %46 {offsets = [0, 16], sizes = [4, 16], strides = [1, 1]} : vector<4x48xf32> to vector<4x16xf32>
    %50 = arith.mulf %49, %33 : vector<4x16xf32>
    %51 = vector.extract_strided_slice %46 {offsets = [0, 0], sizes = [4, 16], strides = [1, 1]} : vector<4x48xf32> to vector<4x16xf32>
    %52 = arith.mulf %51, %48 : vector<4x16xf32>
    %53 = arith.addf %50, %52 : vector<4x16xf32>
    %54 = vector.extract_strided_slice %46 {offsets = [0, 32], sizes = [4, 16], strides = [1, 1]} : vector<4x48xf32> to vector<4x16xf32>
    %55 = math.tanh %53 : vector<4x16xf32>
    %56 = arith.mulf %54, %55 : vector<4x16xf32>
    %57 = arith.addf %37, %56 : vector<4x16xf32>
    %58 = vector.extract_strided_slice %13 {offsets = [8, 0], sizes = [4, 64], strides = [1, 1]} : vector<32x64xf32> to vector<4x64xf32>
    %cst_18 = arith.constant dense<0.000000e+00> : vector<4x64xf32>
    %59 = tpu.matmul %56, %14, %cst_18 {dimension_numbers = #tpu.dot_dimension_numbers<[1], [0], [0], [1], [0, 0, 1, 1], [], []>} : vector<4x16xf32>, vector<16x64xf32>, vector<4x64xf32> -> vector<4x64xf32>
    %60 = arith.addf %58, %59 : vector<4x64xf32>
    %61 = vector.extract_strided_slice %60 {offsets = [0, 0], sizes = [4, 48], strides = [1, 1]} : vector<4x64xf32> to vector<4x48xf32>
    %62 = arith.negf %61 : vector<4x48xf32>
    %63 = math.exp %62 : vector<4x48xf32>
    %cst_19 = arith.constant 1.000000e+00 : f32
    %64 = vector.broadcast %cst_19 : f32 to vector<4x48xf32>
    %65 = arith.addf %64, %63 : vector<4x48xf32>
    %66 = arith.divf %64, %65 : vector<4x48xf32>
    %67 = vector.extract_strided_slice %60 {offsets = [0, 48], sizes = [4, 16], strides = [1, 1]} : vector<4x64xf32> to vector<4x16xf32>
    %68 = math.tanh %67 : vector<4x16xf32>
    %69 = vector.extract_strided_slice %66 {offsets = [0, 16], sizes = [4, 16], strides = [1, 1]} : vector<4x48xf32> to vector<4x16xf32>
    %70 = arith.mulf %69, %53 : vector<4x16xf32>
    %71 = vector.extract_strided_slice %66 {offsets = [0, 0], sizes = [4, 16], strides = [1, 1]} : vector<4x48xf32> to vector<4x16xf32>
    %72 = arith.mulf %71, %68 : vector<4x16xf32>
    %73 = arith.addf %70, %72 : vector<4x16xf32>
    %74 = vector.extract_strided_slice %66 {offsets = [0, 32], sizes = [4, 16], strides = [1, 1]} : vector<4x48xf32> to vector<4x16xf32>
    %75 = math.tanh %73 : vector<4x16xf32>
    %76 = arith.mulf %74, %75 : vector<4x16xf32>
    %77 = arith.addf %57, %76 : vector<4x16xf32>
    %78 = vector.extract_strided_slice %13 {offsets = [12, 0], sizes = [4, 64], strides = [1, 1]} : vector<32x64xf32> to vector<4x64xf32>
    %cst_20 = arith.constant dense<0.000000e+00> : vector<4x64xf32>
    %79 = tpu.matmul %76, %14, %cst_20 {dimension_numbers = #tpu.dot_dimension_numbers<[1], [0], [0], [1], [0, 0, 1, 1], [], []>} : vector<4x16xf32>, vector<16x64xf32>, vector<4x64xf32> -> vector<4x64xf32>
    %80 = arith.addf %78, %79 : vector<4x64xf32>
    %81 = vector.extract_strided_slice %80 {offsets = [0, 0], sizes = [4, 48], strides = [1, 1]} : vector<4x64xf32> to vector<4x48xf32>
    %82 = arith.negf %81 : vector<4x48xf32>
    %83 = math.exp %82 : vector<4x48xf32>
    %cst_21 = arith.constant 1.000000e+00 : f32
    %84 = vector.broadcast %cst_21 : f32 to vector<4x48xf32>
    %85 = arith.addf %84, %83 : vector<4x48xf32>
    %86 = arith.divf %84, %85 : vector<4x48xf32>
    %87 = vector.extract_strided_slice %80 {offsets = [0, 48], sizes = [4, 16], strides = [1, 1]} : vector<4x64xf32> to vector<4x16xf32>
    %88 = math.tanh %87 : vector<4x16xf32>
    %89 = vector.extract_strided_slice %86 {offsets = [0, 16], sizes = [4, 16], strides = [1, 1]} : vector<4x48xf32> to vector<4x16xf32>
    %90 = arith.mulf %89, %73 : vector<4x16xf32>
    %91 = vector.extract_strided_slice %86 {offsets = [0, 0], sizes = [4, 16], strides = [1, 1]} : vector<4x48xf32> to vector<4x16xf32>
    %92 = arith.mulf %91, %88 : vector<4x16xf32>
    %93 = arith.addf %90, %92 : vector<4x16xf32>
    %94 = vector.extract_strided_slice %86 {offsets = [0, 32], sizes = [4, 16], strides = [1, 1]} : vector<4x48xf32> to vector<4x16xf32>
    %95 = math.tanh %93 : vector<4x16xf32>
    %96 = arith.mulf %94, %95 : vector<4x16xf32>
    %97 = arith.addf %77, %96 : vector<4x16xf32>
    %98 = vector.extract_strided_slice %13 {offsets = [16, 0], sizes = [4, 64], strides = [1, 1]} : vector<32x64xf32> to vector<4x64xf32>
    %cst_22 = arith.constant dense<0.000000e+00> : vector<4x64xf32>
    %99 = tpu.matmul %96, %14, %cst_22 {dimension_numbers = #tpu.dot_dimension_numbers<[1], [0], [0], [1], [0, 0, 1, 1], [], []>} : vector<4x16xf32>, vector<16x64xf32>, vector<4x64xf32> -> vector<4x64xf32>
    %100 = arith.addf %98, %99 : vector<4x64xf32>
    %101 = vector.extract_strided_slice %100 {offsets = [0, 0], sizes = [4, 48], strides = [1, 1]} : vector<4x64xf32> to vector<4x48xf32>
    %102 = arith.negf %101 : vector<4x48xf32>
    %103 = math.exp %102 : vector<4x48xf32>
    %cst_23 = arith.constant 1.000000e+00 : f32
    %104 = vector.broadcast %cst_23 : f32 to vector<4x48xf32>
    %105 = arith.addf %104, %103 : vector<4x48xf32>
    %106 = arith.divf %104, %105 : vector<4x48xf32>
    %107 = vector.extract_strided_slice %100 {offsets = [0, 48], sizes = [4, 16], strides = [1, 1]} : vector<4x64xf32> to vector<4x16xf32>
    %108 = math.tanh %107 : vector<4x16xf32>
    %109 = vector.extract_strided_slice %106 {offsets = [0, 16], sizes = [4, 16], strides = [1, 1]} : vector<4x48xf32> to vector<4x16xf32>
    %110 = arith.mulf %109, %93 : vector<4x16xf32>
    %111 = vector.extract_strided_slice %106 {offsets = [0, 0], sizes = [4, 16], strides = [1, 1]} : vector<4x48xf32> to vector<4x16xf32>
    %112 = arith.mulf %111, %108 : vector<4x16xf32>
    %113 = arith.addf %110, %112 : vector<4x16xf32>
    %114 = vector.extract_strided_slice %106 {offsets = [0, 32], sizes = [4, 16], strides = [1, 1]} : vector<4x48xf32> to vector<4x16xf32>
    %115 = math.tanh %113 : vector<4x16xf32>
    %116 = arith.mulf %114, %115 : vector<4x16xf32>
    %117 = arith.addf %97, %116 : vector<4x16xf32>
    %118 = vector.extract_strided_slice %13 {offsets = [20, 0], sizes = [4, 64], strides = [1, 1]} : vector<32x64xf32> to vector<4x64xf32>
    %cst_24 = arith.constant dense<0.000000e+00> : vector<4x64xf32>
    %119 = tpu.matmul %116, %14, %cst_24 {dimension_numbers = #tpu.dot_dimension_numbers<[1], [0], [0], [1], [0, 0, 1, 1], [], []>} : vector<4x16xf32>, vector<16x64xf32>, vector<4x64xf32> -> vector<4x64xf32>
    %120 = arith.addf %118, %119 : vector<4x64xf32>
    %121 = vector.extract_strided_slice %120 {offsets = [0, 0], sizes = [4, 48], strides = [1, 1]} : vector<4x64xf32> to vector<4x48xf32>
    %122 = arith.negf %121 : vector<4x48xf32>
    %123 = math.exp %122 : vector<4x48xf32>
    %cst_25 = arith.constant 1.000000e+00 : f32
    %124 = vector.broadcast %cst_25 : f32 to vector<4x48xf32>
    %125 = arith.addf %124, %123 : vector<4x48xf32>
    %126 = arith.divf %124, %125 : vector<4x48xf32>
    %127 = vector.extract_strided_slice %120 {offsets = [0, 48], sizes = [4, 16], strides = [1, 1]} : vector<4x64xf32> to vector<4x16xf32>
    %128 = math.tanh %127 : vector<4x16xf32>
    %129 = vector.extract_strided_slice %126 {offsets = [0, 16], sizes = [4, 16], strides = [1, 1]} : vector<4x48xf32> to vector<4x16xf32>
    %130 = arith.mulf %129, %113 : vector<4x16xf32>
    %131 = vector.extract_strided_slice %126 {offsets = [0, 0], sizes = [4, 16], strides = [1, 1]} : vector<4x48xf32> to vector<4x16xf32>
    %132 = arith.mulf %131, %128 : vector<4x16xf32>
    %133 = arith.addf %130, %132 : vector<4x16xf32>
    %134 = vector.extract_strided_slice %126 {offsets = [0, 32], sizes = [4, 16], strides = [1, 1]} : vector<4x48xf32> to vector<4x16xf32>
    %135 = math.tanh %133 : vector<4x16xf32>
    %136 = arith.mulf %134, %135 : vector<4x16xf32>
    %137 = arith.addf %117, %136 : vector<4x16xf32>
    %138 = vector.extract_strided_slice %13 {offsets = [24, 0], sizes = [4, 64], strides = [1, 1]} : vector<32x64xf32> to vector<4x64xf32>
    %cst_26 = arith.constant dense<0.000000e+00> : vector<4x64xf32>
    %139 = tpu.matmul %136, %14, %cst_26 {dimension_numbers = #tpu.dot_dimension_numbers<[1], [0], [0], [1], [0, 0, 1, 1], [], []>} : vector<4x16xf32>, vector<16x64xf32>, vector<4x64xf32> -> vector<4x64xf32>
    %140 = arith.addf %138, %139 : vector<4x64xf32>
    %141 = vector.extract_strided_slice %140 {offsets = [0, 0], sizes = [4, 48], strides = [1, 1]} : vector<4x64xf32> to vector<4x48xf32>
    %142 = arith.negf %141 : vector<4x48xf32>
    %143 = math.exp %142 : vector<4x48xf32>
    %cst_27 = arith.constant 1.000000e+00 : f32
    %144 = vector.broadcast %cst_27 : f32 to vector<4x48xf32>
    %145 = arith.addf %144, %143 : vector<4x48xf32>
    %146 = arith.divf %144, %145 : vector<4x48xf32>
    %147 = vector.extract_strided_slice %140 {offsets = [0, 48], sizes = [4, 16], strides = [1, 1]} : vector<4x64xf32> to vector<4x16xf32>
    %148 = math.tanh %147 : vector<4x16xf32>
    %149 = vector.extract_strided_slice %146 {offsets = [0, 16], sizes = [4, 16], strides = [1, 1]} : vector<4x48xf32> to vector<4x16xf32>
    %150 = arith.mulf %149, %133 : vector<4x16xf32>
    %151 = vector.extract_strided_slice %146 {offsets = [0, 0], sizes = [4, 16], strides = [1, 1]} : vector<4x48xf32> to vector<4x16xf32>
    %152 = arith.mulf %151, %148 : vector<4x16xf32>
    %153 = arith.addf %150, %152 : vector<4x16xf32>
    %154 = vector.extract_strided_slice %146 {offsets = [0, 32], sizes = [4, 16], strides = [1, 1]} : vector<4x48xf32> to vector<4x16xf32>
    %155 = math.tanh %153 : vector<4x16xf32>
    %156 = arith.mulf %154, %155 : vector<4x16xf32>
    %157 = arith.addf %137, %156 : vector<4x16xf32>
    %158 = vector.extract_strided_slice %13 {offsets = [28, 0], sizes = [4, 64], strides = [1, 1]} : vector<32x64xf32> to vector<4x64xf32>
    %cst_28 = arith.constant dense<0.000000e+00> : vector<4x64xf32>
    %159 = tpu.matmul %156, %14, %cst_28 {dimension_numbers = #tpu.dot_dimension_numbers<[1], [0], [0], [1], [0, 0, 1, 1], [], []>} : vector<4x16xf32>, vector<16x64xf32>, vector<4x64xf32> -> vector<4x64xf32>
    %160 = arith.addf %158, %159 : vector<4x64xf32>
    %161 = vector.extract_strided_slice %160 {offsets = [0, 0], sizes = [4, 48], strides = [1, 1]} : vector<4x64xf32> to vector<4x48xf32>
    %162 = arith.negf %161 : vector<4x48xf32>
    %163 = math.exp %162 : vector<4x48xf32>
    %cst_29 = arith.constant 1.000000e+00 : f32
    %164 = vector.broadcast %cst_29 : f32 to vector<4x48xf32>
    %165 = arith.addf %164, %163 : vector<4x48xf32>
    %166 = arith.divf %164, %165 : vector<4x48xf32>
    %167 = vector.extract_strided_slice %160 {offsets = [0, 48], sizes = [4, 16], strides = [1, 1]} : vector<4x64xf32> to vector<4x16xf32>
    %168 = math.tanh %167 : vector<4x16xf32>
    %169 = vector.extract_strided_slice %166 {offsets = [0, 16], sizes = [4, 16], strides = [1, 1]} : vector<4x48xf32> to vector<4x16xf32>
    %170 = arith.mulf %169, %153 : vector<4x16xf32>
    %171 = vector.extract_strided_slice %166 {offsets = [0, 0], sizes = [4, 16], strides = [1, 1]} : vector<4x48xf32> to vector<4x16xf32>
    %172 = arith.mulf %171, %168 : vector<4x16xf32>
    %173 = arith.addf %170, %172 : vector<4x16xf32>
    %174 = vector.extract_strided_slice %166 {offsets = [0, 32], sizes = [4, 16], strides = [1, 1]} : vector<4x48xf32> to vector<4x16xf32>
    %175 = math.tanh %173 : vector<4x16xf32>
    %176 = arith.mulf %174, %175 : vector<4x16xf32>
    %177 = arith.addf %157, %176 : vector<4x16xf32>
    %cst_30 = arith.constant 1.250000e-01 : f32
    %178 = vector.broadcast %cst_30 : f32 to vector<4x16xf32>
    %179 = arith.mulf %177, %178 : vector<4x16xf32>
    %180 = tpu.concatenate %7, %179 in 1 : vector<4x64xf32>, vector<4x16xf32> -> vector<4x80xf32>
    %c256 = arith.constant 256 : index
    %c0_31 = arith.constant 0 : index
    %181 = vector.load %arg2[%c256, %c0_31] : memref<888x128xf32, #tpu.memory_space<vmem>>, vector<80x96xf32>
    %cst_32 = arith.constant dense<0.000000e+00> : vector<4x96xf32>
    %182 = tpu.matmul %180, %181, %cst_32 {dimension_numbers = #tpu.dot_dimension_numbers<[1], [0], [0], [1], [0, 0, 1, 1], [], []>} : vector<4x80xf32>, vector<80x96xf32>, vector<4x96xf32> -> vector<4x96xf32>
    %c336 = arith.constant 336 : index
    %c0_33 = arith.constant 0 : index
    %183 = vector.load %arg2[%c336, %c0_33] : memref<888x128xf32, #tpu.memory_space<vmem>>, vector<1x96xf32>
    %184 = vector.broadcast %183 : vector<1x96xf32> to vector<4x96xf32>
    %185 = arith.addf %182, %184 : vector<4x96xf32>
    %c344 = arith.constant 344 : index
    %c0_34 = arith.constant 0 : index
    %186 = vector.load %arg2[%c344, %c0_34] : memref<888x128xf32, #tpu.memory_space<vmem>>, vector<96x8xf32>
    %cst_35 = arith.constant dense<0.000000e+00> : vector<4x8xf32>
    %187 = tpu.matmul %185, %186, %cst_35 {dimension_numbers = #tpu.dot_dimension_numbers<[1], [0], [0], [1], [0, 0, 1, 1], [], []>} : vector<4x96xf32>, vector<96x8xf32>, vector<4x8xf32> -> vector<4x8xf32>
    %c440 = arith.constant 440 : index
    %c0_36 = arith.constant 0 : index
    %188 = vector.load %arg2[%c440, %c0_36] : memref<888x128xf32, #tpu.memory_space<vmem>>, vector<1x8xf32>
    %189 = vector.broadcast %188 : vector<1x8xf32> to vector<4x8xf32>
    %190 = arith.addf %187, %189 : vector<4x8xf32>
    %191 = arith.negf %190 : vector<4x8xf32>
    %192 = math.exp %191 : vector<4x8xf32>
    %cst_37 = arith.constant 1.000000e+00 : f32
    %193 = vector.broadcast %cst_37 : f32 to vector<4x8xf32>
    %194 = arith.addf %193, %192 : vector<4x8xf32>
    %195 = arith.divf %193, %194 : vector<4x8xf32>
    %cst_38 = arith.constant dense<0xFF800000> : vector<4xf32>
    %196 = vector.multi_reduction <maximumf>, %195, %cst_38 [1] : vector<4x8xf32> to vector<4xf32>
    %197 = vector.shape_cast %196 : vector<4xf32> to vector<4x1xf32>
    %198 = vector.broadcast %197 : vector<4x1xf32> to vector<4x8xf32>
    %199 = arith.cmpf oge, %195, %198 : vector<4x8xf32>
    %cst_39 = arith.constant 0xFF800000 : f32
    %200 = vector.broadcast %cst_39 : f32 to vector<4x8xf32>
    %201 = arith.select %199, %200, %195 : vector<4x8xi1>, vector<4x8xf32>
    %cst_40 = arith.constant dense<0xFF800000> : vector<4xf32>
    %202 = vector.multi_reduction <maximumf>, %201, %cst_40 [1] : vector<4x8xf32> to vector<4xf32>
    %203 = vector.shape_cast %202 : vector<4xf32> to vector<4x1xf32>
    %204 = vector.broadcast %203 : vector<4x1xf32> to vector<4x8xf32>
    %205 = arith.cmpf oge, %201, %204 : vector<4x8xf32>
    %cst_41 = arith.constant 0xFF800000 : f32
    %206 = vector.broadcast %cst_41 : f32 to vector<4x8xf32>
    %207 = arith.select %205, %206, %201 : vector<4x8xi1>, vector<4x8xf32>
    %cst_42 = arith.constant dense<0xFF800000> : vector<4xf32>
    %208 = vector.multi_reduction <maximumf>, %207, %cst_42 [1] : vector<4x8xf32> to vector<4xf32>
    %209 = vector.shape_cast %208 : vector<4xf32> to vector<4x1xf32>
    %210 = vector.broadcast %209 : vector<4x1xf32> to vector<4x8xf32>
    %211 = arith.cmpf oge, %195, %210 : vector<4x8xf32>
    %cst_43 = arith.constant 2.000000e-01 : f32
    %212 = vector.broadcast %cst_43 : f32 to vector<4x8xf32>
    %213 = arith.cmpf ogt, %195, %212 : vector<4x8xf32>
    %214 = arith.andi %211, %213 : vector<4x8xi1>
    %cst_44 = arith.constant 0.000000e+00 : f32
    %215 = vector.broadcast %cst_44 : f32 to vector<4x8xf32>
    %216 = arith.select %214, %195, %215 : vector<4x8xi1>, vector<4x8xf32>
    %cst_45 = arith.constant dense<0.000000e+00> : vector<8xf32>
    %217 = vector.multi_reduction <add>, %195, %cst_45 [0] : vector<4x8xf32> to vector<8xf32>
    %218 = vector.shape_cast %217 : vector<8xf32> to vector<1x8xf32>
    %cst_46 = arith.constant 4.000000e+00 : f32
    %219 = vector.broadcast %cst_46 : f32 to vector<1x8xf32>
    %220 = arith.divf %218, %219 : vector<1x8xf32>
    %cst_47 = arith.constant dense<0.000000e+00> : vector<8xf32>
    %221 = vector.multi_reduction <add>, %216, %cst_47 [0] : vector<4x8xf32> to vector<8xf32>
    %222 = vector.shape_cast %221 : vector<8xf32> to vector<1x8xf32>
    %cst_48 = arith.constant 9.99999993E-9 : f32
    %223 = vector.broadcast %cst_48 : f32 to vector<1x8xf32>
    %224 = arith.addf %222, %223 : vector<1x8xf32>
    %225 = tpu.reciprocal %224 {approx = true} : vector<1x8xf32> -> vector<1x8xf32>
    %226 = vector.broadcast %225 : vector<1x8xf32> to vector<4x8xf32>
    %227 = arith.mulf %216, %226 : vector<4x8xf32>
    %cst_49 = arith.constant dense<0.000000e+00> : vector<4x4xf32>
    %228 = tpu.matmul %227, %216, %cst_49 {dimension_numbers = #tpu.dot_dimension_numbers<[1], [1], [0], [0], [0, 0, 1, 0], [], []>} : vector<4x8xf32>, vector<4x8xf32>, vector<4x4xf32> -> vector<4x4xf32>
    %229 = vector.broadcast %220 : vector<1x8xf32> to vector<4x8xf32>
    %230 = arith.mulf %216, %229 : vector<4x8xf32>
    %cst_50 = arith.constant dense<0.000000e+00> : vector<4xf32>
    %231 = vector.multi_reduction <add>, %230, %cst_50 [1] : vector<4x8xf32> to vector<4xf32>
    %cst_51 = arith.constant 9.99999993E-9 : f32
    %232 = vector.broadcast %cst_51 : f32 to vector<4xf32>
    %233 = arith.addf %231, %232 : vector<4xf32>
    %234 = math.rsqrt %233 : vector<4xf32>
    %235 = vector.shape_cast %234 : vector<4xf32> to vector<4x1xf32>
    %236 = vector.broadcast %235 : vector<4x1xf32> to vector<4x4xf32>
    %237 = arith.mulf %236, %228 : vector<4x4xf32>
    %238 = vector.shape_cast %234 : vector<4xf32> to vector<1x4xf32>
    %239 = vector.broadcast %238 : vector<1x4xf32> to vector<4x4xf32>
    %240 = arith.mulf %237, %239 : vector<4x4xf32>
    %cst_52 = arith.constant 0.000000e+00 : f32
    %241 = vector.broadcast %cst_52 : f32 to vector<4x4xf32>
    %242 = arith.subf %241, %240 : vector<4x4xf32>
    %c448 = arith.constant 448 : index
    %c0_53 = arith.constant 0 : index
    %243 = vector.load %arg2[%c448, %c0_53] : memref<888x128xf32, #tpu.memory_space<vmem>>, vector<288x32xf32>
    %c736 = arith.constant 736 : index
    %c0_54 = arith.constant 0 : index
    %244 = vector.load %arg2[%c736, %c0_54] : memref<888x128xf32, #tpu.memory_space<vmem>>, vector<1x32xf32>
    %cst_55 = arith.constant dense<0.000000e+00> : vector<4x96xf32>
    %245 = tpu.matmul %242, %185, %cst_55 {dimension_numbers = #tpu.dot_dimension_numbers<[1], [0], [0], [1], [0, 0, 1, 1], [], []>} : vector<4x4xf32>, vector<4x96xf32>, vector<4x96xf32> -> vector<4x96xf32>
    %cst_56 = arith.constant dense<0.000000e+00> : vector<4x96xf32>
    %246 = tpu.matmul %242, %245, %cst_56 {dimension_numbers = #tpu.dot_dimension_numbers<[1], [0], [0], [1], [0, 0, 1, 1], [], []>} : vector<4x4xf32>, vector<4x96xf32>, vector<4x96xf32> -> vector<4x96xf32>
    %cst_57 = arith.constant 2.000000e+00 : f32
    %247 = vector.broadcast %cst_57 : f32 to vector<4x96xf32>
    %248 = arith.mulf %247, %246 : vector<4x96xf32>
    %249 = arith.subf %248, %185 : vector<4x96xf32>
    %250 = tpu.concatenate %185, %245, %249 in 1 : vector<4x96xf32>, vector<4x96xf32>, vector<4x96xf32> -> vector<4x288xf32>
    %cst_58 = arith.constant dense<0.000000e+00> : vector<4x32xf32>
    %251 = tpu.matmul %250, %243, %cst_58 {dimension_numbers = #tpu.dot_dimension_numbers<[1], [0], [0], [1], [0, 0, 1, 1], [], []>} : vector<4x288xf32>, vector<288x32xf32>, vector<4x32xf32> -> vector<4x32xf32>
    %252 = vector.broadcast %244 : vector<1x32xf32> to vector<4x32xf32>
    %253 = arith.addf %251, %252 : vector<4x32xf32>
    %cst_59 = arith.constant 0.000000e+00 : f32
    %254 = vector.broadcast %cst_59 : f32 to vector<4x32xf32>
    %255 = arith.maximumf %253, %254 : vector<4x32xf32>
    %c744 = arith.constant 744 : index
    %c0_60 = arith.constant 0 : index
    %256 = vector.load %arg2[%c744, %c0_60] : memref<888x128xf32, #tpu.memory_space<vmem>>, vector<96x16xf32>
    %c840 = arith.constant 840 : index
    %c0_61 = arith.constant 0 : index
    %257 = vector.load %arg2[%c840, %c0_61] : memref<888x128xf32, #tpu.memory_space<vmem>>, vector<1x16xf32>
    %cst_62 = arith.constant dense<0.000000e+00> : vector<4x32xf32>
    %258 = tpu.matmul %242, %255, %cst_62 {dimension_numbers = #tpu.dot_dimension_numbers<[1], [0], [0], [1], [0, 0, 1, 1], [], []>} : vector<4x4xf32>, vector<4x32xf32>, vector<4x32xf32> -> vector<4x32xf32>
    %cst_63 = arith.constant dense<0.000000e+00> : vector<4x32xf32>
    %259 = tpu.matmul %242, %258, %cst_63 {dimension_numbers = #tpu.dot_dimension_numbers<[1], [0], [0], [1], [0, 0, 1, 1], [], []>} : vector<4x4xf32>, vector<4x32xf32>, vector<4x32xf32> -> vector<4x32xf32>
    %cst_64 = arith.constant 2.000000e+00 : f32
    %260 = vector.broadcast %cst_64 : f32 to vector<4x32xf32>
    %261 = arith.mulf %260, %259 : vector<4x32xf32>
    %262 = arith.subf %261, %255 : vector<4x32xf32>
    %263 = tpu.concatenate %255, %258, %262 in 1 : vector<4x32xf32>, vector<4x32xf32>, vector<4x32xf32> -> vector<4x96xf32>
    %cst_65 = arith.constant dense<0.000000e+00> : vector<4x16xf32>
    %264 = tpu.matmul %263, %256, %cst_65 {dimension_numbers = #tpu.dot_dimension_numbers<[1], [0], [0], [1], [0, 0, 1, 1], [], []>} : vector<4x96xf32>, vector<96x16xf32>, vector<4x16xf32> -> vector<4x16xf32>
    %265 = vector.broadcast %257 : vector<1x16xf32> to vector<4x16xf32>
    %266 = arith.addf %264, %265 : vector<4x16xf32>
    %cst_66 = arith.constant 0.000000e+00 : f32
    %267 = vector.broadcast %cst_66 : f32 to vector<4x16xf32>
    %268 = arith.maximumf %266, %267 : vector<4x16xf32>
    %c848 = arith.constant 848 : index
    %c0_67 = arith.constant 0 : index
    %269 = vector.load %arg2[%c848, %c0_67] : memref<888x128xf32, #tpu.memory_space<vmem>>, vector<16x8xf32>
    %cst_68 = arith.constant dense<0.000000e+00> : vector<4x8xf32>
    %270 = tpu.matmul %268, %269, %cst_68 {dimension_numbers = #tpu.dot_dimension_numbers<[1], [0], [0], [1], [0, 0, 1, 1], [], []>} : vector<4x16xf32>, vector<16x8xf32>, vector<4x8xf32> -> vector<4x8xf32>
    %c864 = arith.constant 864 : index
    %c0_69 = arith.constant 0 : index
    %271 = vector.load %arg2[%c864, %c0_69] : memref<888x128xf32, #tpu.memory_space<vmem>>, vector<1x8xf32>
    %272 = vector.broadcast %271 : vector<1x8xf32> to vector<4x8xf32>
    %273 = arith.addf %270, %272 : vector<4x8xf32>
    %cst_70 = arith.constant 0.000000e+00 : f32
    %274 = vector.broadcast %cst_70 : f32 to vector<4x8xf32>
    %275 = arith.maximumf %273, %274 : vector<4x8xf32>
    %c872 = arith.constant 872 : index
    %c0_71 = arith.constant 0 : index
    %276 = vector.load %arg2[%c872, %c0_71] : memref<888x128xf32, #tpu.memory_space<vmem>>, vector<8x128xf32>
    %cst_72 = arith.constant dense<0.000000e+00> : vector<4x128xf32>
    %277 = tpu.matmul %275, %276, %cst_72 {dimension_numbers = #tpu.dot_dimension_numbers<[1], [0], [0], [1], [0, 0, 1, 1], [], []>} : vector<4x8xf32>, vector<8x128xf32>, vector<4x128xf32> -> vector<4x128xf32>
    %c880 = arith.constant 880 : index
    %c0_73 = arith.constant 0 : index
    %278 = vector.load %arg2[%c880, %c0_73] : memref<888x128xf32, #tpu.memory_space<vmem>>, vector<1x128xf32>
    %279 = vector.broadcast %278 : vector<1x128xf32> to vector<4x128xf32>
    %280 = arith.addf %277, %279 : vector<4x128xf32>
    %c0_74 = arith.constant 0 : index
    %c0_75 = arith.constant 0 : index
    %281 = vector.load %arg3[%c0_74, %c0_75] : memref<4x128xf32, #tpu.memory_space<vmem>>, vector<4x128xf32>
    tpu.vector_store %arg3[%c0_74, %c0_75], %280 {strides = array<i32>} : memref<4x128xf32, #tpu.memory_space<vmem>>, vector<4x128xf32>,
    %cst_76 = arith.constant dense<0.000000e+00> : vector<4xf32>
    %282 = vector.multi_reduction <add>, %216, %cst_76 [1] : vector<4x8xf32> to vector<4xf32>
    %cst_77 = arith.constant 9.99999993E-9 : f32
    %283 = vector.broadcast %cst_77 : f32 to vector<4xf32>
    %284 = arith.addf %282, %283 : vector<4xf32>
    %285 = vector.shape_cast %284 : vector<4xf32> to vector<4x1xf32>
    %286 = vector.broadcast %285 : vector<4x1xf32> to vector<4x16xf32>
    %287 = arith.mulf %286, %268 : vector<4x16xf32>
    %cst_78 = arith.constant dense<0.000000e+00> : vector<4x16xf32>
    %288 = tpu.matmul %228, %268, %cst_78 {dimension_numbers = #tpu.dot_dimension_numbers<[1], [0], [0], [1], [0, 0, 1, 1], [], []>} : vector<4x4xf32>, vector<4x16xf32>, vector<4x16xf32> -> vector<4x16xf32>
    %289 = arith.subf %287, %288 : vector<4x16xf32>
    %290 = arith.mulf %268, %289 : vector<4x16xf32>
    %cst_79 = arith.constant dense<0.000000e+00> : vector<16xf32>
    %291 = vector.multi_reduction <add>, %290, %cst_79 [0] : vector<4x16xf32> to vector<16xf32>
    %292 = vector.shape_cast %291 : vector<16xf32> to vector<1x16xf32>
    %293 = vector.shape_cast %284 : vector<4xf32> to vector<4x1xf32>
    %294 = vector.broadcast %293 : vector<4x1xf32> to vector<4x16xf32>
    %295 = arith.mulf %294, %268 : vector<4x16xf32>
    %296 = arith.mulf %295, %268 : vector<4x16xf32>
    %cst_80 = arith.constant dense<0.000000e+00> : vector<16xf32>
    %297 = vector.multi_reduction <add>, %296, %cst_80 [0] : vector<4x16xf32> to vector<16xf32>
    %298 = vector.shape_cast %297 : vector<16xf32> to vector<1x16xf32>
    %cst_81 = arith.constant 9.99999993E-9 : f32
    %299 = vector.broadcast %cst_81 : f32 to vector<1x16xf32>
    %300 = arith.addf %298, %299 : vector<1x16xf32>
    %301 = tpu.reciprocal %300 {approx = true} : vector<1x16xf32> -> vector<1x16xf32>
    %302 = arith.mulf %292, %301 : vector<1x16xf32>
    %303 = vector.shape_cast %302 : vector<1x16xf32> to vector<1x1x16xf32>
    %cst_82 = arith.constant dense<0.000000e+00> : vector<1xf32>
    %304 = vector.multi_reduction <add>, %303, %cst_82 [1, 2] : vector<1x1x16xf32> to vector<1xf32>
    %305 = vector.shape_cast %304 : vector<1xf32> to vector<1x1x1xf32>
    %306 = vector.extract %305[0, 0, 0] : f32 from vector<1x1x1xf32>
    %cst_83 = arith.constant 1.600000e+01 : f32
    %307 = arith.divf %306, %cst_83 : f32
    %308 = vector.broadcast %307 : f32 to vector<1x128xf32>
    %c0_84 = arith.constant 0 : index
    %c0_85 = arith.constant 0 : index
    %309 = vector.load %arg4[%c0_84, %c0_85] : memref<1x128xf32, #tpu.memory_space<vmem>>, vector<1x128xf32>
    tpu.vector_store %arg4[%c0_84, %c0_85], %308 {strides = array<i32>} : memref<1x128xf32, #tpu.memory_space<vmem>>, vector<1x128xf32>,
    return
  }
}

</mosaic_0001>

<bundles_post_ra>
// kernel: _lambda_.1
= control target key start
LH: loop header
LB: loop body
LE: loop exit
PB: predicated region body
PF: predicated region fallthrough
CT: control target
= control target key end

     0   :  { %10 = vsyncpa [#allocation3], 0  ;;  %vm141_vm0 = vcmask 130048   ;;  %v2979_v5 = vmov 0.0|0.0   ;;  %s3613_s0 = inlined_call_operand.vmem [shape: f32[4,204], index: 0, kind: input, shape index: {}]   ;;  %s3614_s1 = inlined_call_operand.vmem [shape: f32[32,16], index: 1, kind: input, shape index: {}]   ;;  %s3615_s2 = inlined_call_operand.vmem [shape: f32[888,128], index: 2, kind: input, shape index: {}]   ;;  %s3616_s3 = inlined_call_operand.hbm [shape: f32[4,128], index: 3, kind: output, shape index: {0}]   ;;  %s3617_s4 = inlined_call_operand.hbm [shape: f32[1,128], index: 4, kind: output, shape index: {1}]  }
   0x1   :  { %v134_v0 = vld [vmem:[%s3615_s2 + $0xd8] sm:$0xff]  ;;  %v135_v1 = vld [vmem:[%s3615_s2 + $0xe0] sm:$0xff]  ;;  %v239_v4 = vld [vmem:[%s3615_s2 + $0xe8] sm:$0xff]  ;;  %2683 = vmatprep.subr.bf16.mxu0 %v2979_v5 }
   0x2   :  { %v130_v2 = vld [vmem:[%s3614_s1] sm:$0xff]  ;;  %v2723_v3 = vpack.c.bf16 %v135_v1, %v134_v0  ;;  %v240_v6 = vld [vmem:[%s3615_s2 + $0xf0] sm:$0xff] }
   0x3   :  { %2491 = vmatprep.mubr.msk.f32.mxu1 %vm141_vm0, %v130_v2 }
   0x4   :  { %11 = vsyncpa [#allocation5], 0  ;;  %2724 = vmatprep.subr.bf16.mxu1 %v2723_v3  ;;  %v131_v7 = vld [vmem:[%s3614_s1 + $0x8] sm:$0xff]  ;;  %v3035_v8 = vpack.c.bf16 %v240_v6, %v239_v4  ;;  %v132_v9 = vld [vmem:[%s3614_s1 + $0x10] sm:$0xff]  ;;  %vm2980_vm1 = vmmov 0   ;;  %v2981_v11 = vmov 0.0  }
   0x5   :  { %2726 = vmatpush3.bf16.msra.mxu1 %v2723_v3  ;;  %v133_v10 = vld [vmem:[%s3614_s1 + $0x18] sm:$0xff]  ;;  %s2982_s6 = smov 80   ;;  %s2983_s7 = smov 16   ;;  %vm52_vm2 = vcmask 621568   ;;  %vm55_vm3 = vcmask 1043456   ;;  %vm2985_vm4 = vmmov 1  }
   0x6   :  { %2727 = vmatprep.subr.bf16.mxu1 %v2979_v5  ;;  %v2318_v12 = vld [vmem:[%s3615_s2 + $0xf8] ss:$0 sm:$0xff]  ;;  %s2984_s8 = smov 96   ;;  %vm2721_vm5 = vmpackc.low %vm55_vm3, %vm2985_vm4  ;;  %s2986_s21 = smov 32   ;;  %vm1094_vm6 = vcmask 523264   ;;  %vm1111_vm7 = vcmask 654336  }
   0x7   :  { %vm1202_vm8 = vcmask 785408   ;;  %vm1282_vm9 = vcmask 60416   ;;  %vm1319_vm14 = vcmask 64512   ;;  %s2987_s27 = smov 64   ;;  %vm1618_vm4 = vcmask 261120  }
   0x8   :  { %2492 = vmatmul.mubr.msk.f32.vlgmr.msra.gmra.mrb[0].mxu1 %vm141_vm0, %v131_v7 }
   0x9   :  { %2494 = vmatprep.mubr.msk.f32.mxu1 %vm141_vm0, %v132_v9  ;;  %2729 = vmatpush3.bf16.msra.mxu1 %v3035_v8 }
   0xa   :  { %2730 = vmatprep.subr.bf16.mxu1 %v2979_v5 }
   0xc   :  { %2495 = vmatmul.mubr.msk.f32.gmra.mrb[2].mxu1 %vm141_vm0, %v133_v10 }
   0xd   :  { %2501 = vmatprep.mubr.msk.f32.mxu1 %vm2980_vm1, %v2981_v11 }
  0x10   :  { %2502 = vmatmul.mubr.f32.vlgmr.msra.gmra.mrb[4].mxu1 %v2981_v11 }
  0x11   :  { %2732 = vmatpush3.bf16.msra.mxu1 %v3035_v8  ;;  %2508 = vmatprep.mubr.msk.f32.mxu1 %vm2980_vm1, %v2981_v11 }
  0x12   :  { %2733 = vmatprep.subr.bf16.mxu1 %v2979_v5 }
  0xdb   :  { %v2493_v13 = vpop.f32.mrb[0].mxu1 }
  0xdc   :  { %v3059_v14 = vadd.f32 %v2493_v13, %v2318_v12  ;;  %v220_v15 = vpop.f32.mrb[1].mxu1 }
  0xdd   :  { %v221_v20 = vadd.f32 %v2318_v12, %v220_v15 }
  0xdf   :  { %v2496_v16 = vpop.f32.mrb[2].mxu1 }
  0xe0   :  { %v3061_v17 = vadd.f32 %v2496_v16, %v2318_v12  ;;  %v230_v18 = vpop.f32.mrb[3].mxu1 }
  0xe1   :  { %v3063_v19 = vadd.f32 %v2318_v12, %v230_v18 }
  0xe3   :  { %v310_v21 = vpop.f32.mrb[4].mxu1 }
  0xe4   :  { %v314_v22 = vadd.f32 %v310_v21, %v221_v20  ;;  %v2503_v23 = vpop.f32.mrb[5].mxu1 }
  0xe6   :  { %2857 = vtanh.f32 %v314_v22  ;;  %v2323_v25 = vmul.f32 -1.442695, %v314_v22 }
  0xe8   :  { %2859 = vpow2.f32 %v2323_v25 }
  0xf0   :  { %v2858_v24 = vpop.eup %2857 }
  0xf1   :  { %324 = vrot.lane.b32.xlu0 %v2858_v24, %s2982_s6 }
  0xf2   :  { %v2860_v26 = vpop.eup %2859 }
  0xf3   :  { %v318_v27 = vadd.f32 1.0, %v2860_v26 }
  0xf5   :  { %2861 = vrcp.f32 %v318_v27 }
  0xff   :  { %v2862_v28 = vpop.eup %2861 }
 0x100   :  { %v322_v31 = vmul.f32 0.0, %v2862_v28 }
 0x163   :  { %v325_v29 = vpop.permute.xlu0 %324 }
 0x164   :  { %v327_v30 = vmul.f32 %v2862_v28, %v325_v29 }
 0x166   :  { %329 = vrot.lane.b32.xlu0 %v327_v30, %s2983_s7 }
 0x1d8   :  { %v330_v32 = vpop.permute.xlu0 %329 }
 0x1d9   :  { %v332_v33 = vadd.f32 %v330_v32, %v322_v31 }
 0x1db   :  { %2863 = vtanh.f32 %v332_v33  ;;  %v427_v49 = vrot.slane %v332_v33, 4 }
 0x1e5   :  { %v2864_v34 = vpop.eup %2863 }
 0x1e6   :  { %335 = vrot.lane.b32.xlu1 %v2864_v34, %s2983_s7 }
 0x258   :  { %v336_v35 = vpop.permute.xlu1 %335 }
 0x259   :  { %v3068_v36 = vmul.f32 %v2862_v28, %v336_v35 }
 0x25b   :  { %341 = vrot.lane.b32.xlu1 %v3068_v36, %s2984_s8 }
 0x2cd   :  { %v342_v37 = vpop.permute.xlu1 %341 }
 0x2ce   :  { %2509 = vmatmul.mubr.msk.f32.vlgmr.msra.gmra.mrb[6].mxu1 %vm141_vm0, %v342_v37 }
 0x2cf   :  { %2735 = vmatpush3.bf16.msra.mxu1 %v3035_v8  ;;  %2515 = vmatprep.mubr.msk.f32.mxu1 %vm2980_vm1, %v2981_v11 }
 0x2d0   :  { %2736 = vmatprep.subr.bf16.mxu1 %v2979_v5 }
 0x3a1   :  { %v411_v38 = vpop.f32.mrb[6].mxu1 }
 0x3a2   :  { %v416_v39 = vrot.slane %v411_v38, 4  ;;  %v2510_v40 = vpop.f32.mrb[7].mxu1 }
 0x3a4   :  { %v418_v41 = vadd.f32 %v416_v39, %v221_v20 }
 0x3a6   :  { %2865 = vtanh.f32 %v418_v41  ;;  %v2325_v43 = vmul.f32 -1.442695, %v418_v41 }
 0x3a8   :  { %2867 = vpow2.f32 %v2325_v43 }
 0x3b0   :  { %v2866_v42 = vpop.eup %2865 }
 0x3b1   :  { %431 = vrot.lane.b32.xlu0 %v2866_v42, %s2982_s6 }
 0x3b2   :  { %v2868_v44 = vpop.eup %2867 }
 0x3b3   :  { %v422_v45 = vadd.f32 1.0, %v2868_v44 }
 0x3b5   :  { %2869 = vrcp.f32 %v422_v45 }
 0x3bf   :  { %v2870_v46 = vpop.eup %2869 }
 0x3c0   :  { %v429_v50 = vmul.f32 %v2870_v46, %v427_v49 }
 0x423   :  { %v432_v47 = vpop.permute.xlu0 %431 }
 0x424   :  { %v434_v48 = vmul.f32 %v2870_v46, %v432_v47 }
 0x426   :  { %436 = vrot.lane.b32.xlu1 %v434_v48, %s2983_s7 }
 0x498   :  { %v437_v51 = vpop.permute.xlu1 %436 }
 0x499   :  { %v439_v52 = vadd.f32 %v437_v51, %v429_v50 }
 0x49b   :  { %2871 = vtanh.f32 %v439_v52  ;;  %v533_v4 = vrot.slane %v439_v52, 4 }
 0x4a5   :  { %v2872_v53 = vpop.eup %2871 }
 0x4a6   :  { %442 = vrot.lane.b32.xlu0 %v2872_v53, %s2983_s7 }
 0x518   :  { %v443_v54 = vpop.permute.xlu0 %442 }
 0x519   :  { %v445_v55 = vmul.f32 %v2870_v46, %v443_v54 }
 0x51b   :  { %v447_v56 = vrot.slane %v445_v55, 4 }
 0x51d   :  { %450 = vrot.lane.b32.xlu1 %v447_v56, %s2984_s8  ;;  %v449_v13 = vadd.f32 %v447_v56, %v3068_v36 }
 0x58f   :  { %v451_v57 = vpop.permute.xlu1 %450 }
 0x590   :  { %2516 = vmatmul.mubr.msk.f32.vlgmr.msra.gmra.mrb[8].mxu1 %vm141_vm0, %v451_v57 }
 0x591   :  { %2738 = vmatpush3.bf16.msra.mxu1 %v3035_v8  ;;  %2522 = vmatprep.mubr.msk.f32.mxu1 %vm2980_vm1, %v2981_v11 }
 0x592   :  { %2739 = vmatprep.subr.bf16.mxu1 %v2979_v5 }
 0x663   :  { %v520_v58 = vpop.f32.mrb[8].mxu1 }
 0x664   :  { %v524_v59 = vadd.f32 %v520_v58, %v3059_v14  ;;  %v2517_v60 = vpop.f32.mrb[9].mxu1 }
 0x666   :  { %2873 = vtanh.f32 %v524_v59  ;;  %v2327_v62 = vmul.f32 -1.442695, %v524_v59 }
 0x668   :  { %2875 = vpow2.f32 %v2327_v62 }
 0x670   :  { %v2874_v61 = vpop.eup %2873 }
 0x671   :  { %537 = vrot.lane.b32.xlu0 %v2874_v61, %s2982_s6 }
 0x672   :  { %v2876_v63 = vpop.eup %2875 }
 0x673   :  { %v528_v0 = vadd.f32 1.0, %v2876_v63 }
 0x675   :  { %2877 = vrcp.f32 %v528_v0 }
 0x67f   :  { %v2878_v1 = vpop.eup %2877 }
 0x680   :  { %v535_v6 = vmul.f32 %v2878_v1, %v533_v4 }
 0x6e3   :  { %v538_v2 = vpop.permute.xlu0 %537 }
 0x6e4   :  { %v540_v3 = vmul.f32 %v2878_v1, %v538_v2 }
 0x6e6   :  { %542 = vrot.lane.b32.xlu1 %v540_v3, %s2983_s7 }
 0x758   :  { %v543_v7 = vpop.permute.xlu1 %542 }
 0x759   :  { %v545_v9 = vadd.f32 %v543_v7, %v535_v6 }
 0x75b   :  { %2879 = vtanh.f32 %v545_v9  ;;  %v640_v31 = vrot.slane %v545_v9, 4 }
 0x765   :  { %v2880_v10 = vpop.eup %2879 }
 0x766   :  { %548 = vrot.lane.b32.xlu0 %v2880_v10, %s2983_s7 }
 0x7d8   :  { %v549_v12 = vpop.permute.xlu0 %548 }
 0x7d9   :  { %v551_v15 = vmul.f32 %v2878_v1, %v549_v12 }
 0x7db   :  { %v552_v16 = vadd.f32 %v551_v15, %v449_v13  ;;  %554 = vrot.lane.b32.xlu1 %v551_v15, %s2984_s8 }
 0x84d   :  { %v555_v18 = vpop.permute.xlu1 %554 }
 0x84e   :  { %2523 = vmatmul.mubr.msk.f32.vlgmr.msra.gmra.mrb[10].mxu1 %vm141_vm0, %v555_v18 }
 0x84f   :  { %2741 = vmatpush3.bf16.msra.mxu1 %v3035_v8  ;;  %2529 = vmatprep.mubr.msk.f32.mxu1 %vm2980_vm1, %v2981_v11 }
 0x850   :  { %2742 = vmatprep.subr.bf16.mxu1 %v2979_v5 }
 0x921   :  { %v624_v20 = vpop.f32.mrb[10].mxu1 }
 0x922   :  { %v629_v21 = vrot.slane %v624_v20, 4  ;;  %v2524_v22 = vpop.f32.mrb[11].mxu1 }
 0x924   :  { %v631_v23 = vadd.f32 %v629_v21, %v3059_v14 }
 0x926   :  { %2881 = vtanh.f32 %v631_v23  ;;  %v2329_v25 = vmul.f32 -1.442695, %v631_v23 }
 0x928   :  { %2883 = vpow2.f32 %v2329_v25 }
 0x930   :  { %v2882_v24 = vpop.eup %2881 }
 0x931   :  { %644 = vrot.lane.b32.xlu0 %v2882_v24, %s2982_s6 }
 0x932   :  { %v2884_v26 = vpop.eup %2883 }
 0x933   :  { %v635_v27 = vadd.f32 1.0, %v2884_v26 }
 0x935   :  { %2885 = vrcp.f32 %v635_v27 }
 0x93f   :  { %v2886_v28 = vpop.eup %2885 }
 0x940   :  { %v642_v32 = vmul.f32 %v2886_v28, %v640_v31 }
 0x9a3   :  { %v645_v29 = vpop.permute.xlu0 %644 }
 0x9a4   :  { %v647_v30 = vmul.f32 %v2886_v28, %v645_v29 }
 0x9a6   :  { %649 = vrot.lane.b32.xlu1 %v647_v30, %s2983_s7 }
 0xa18   :  { %v650_v33 = vpop.permute.xlu1 %649 }
 0xa19   :  { %v652_v34 = vadd.f32 %v650_v33, %v642_v32 }
 0xa1b   :  { %2887 = vtanh.f32 %v652_v34  ;;  %v746_v50 = vrot.slane %v652_v34, 4 }
 0xa25   :  { %v2888_v14 = vpop.eup %2887 }
 0xa26   :  { %655 = vrot.lane.b32.xlu0 %v2888_v14, %s2983_s7 }
 0xa98   :  { %v656_v35 = vpop.permute.xlu0 %655 }
 0xa99   :  { %v658_v36 = vmul.f32 %v2886_v28, %v656_v35 }
 0xa9b   :  { %v660_v37 = vrot.slane %v658_v36, 4 }
 0xa9d   :  { %v662_v38 = vadd.f32 %v660_v37, %v552_v16  ;;  %663 = vrot.lane.b32.xlu1 %v660_v37, %s2984_s8 }
 0xb0f   :  { %v664_v39 = vpop.permute.xlu1 %663 }
 0xb10   :  { %2530 = vmatmul.mubr.msk.f32.vlgmr.msra.gmra.mrb[12].mxu1 %vm141_vm0, %v664_v39 }
 0xb11   :  { %2744 = vmatpush3.bf16.msra.mxu1 %v3035_v8  ;;  %2536 = vmatprep.mubr.msk.f32.mxu1 %vm2980_vm1, %v2981_v11 }
 0xb12   :  { %2745 = vmatprep.subr.bf16.mxu1 %v2979_v5 }
 0xbe3   :  { %v733_v40 = vpop.f32.mrb[12].mxu1 }
 0xbe4   :  { %v737_v41 = vadd.f32 %v733_v40, %v3063_v19  ;;  %v2531_v42 = vpop.f32.mrb[13].mxu1 }
 0xbe5   :  { %v19_v42 = vld [vmem:[%s3615_s2] sm:$0xff] }
 0xbe6   :  { %2889 = vtanh.f32 %v737_v41  ;;  %v2331_v44 = vmul.f32 -1.442695, %v737_v41 }
 0xbe8   :  { %2891 = vpow2.f32 %v2331_v44  ;;  %v21_v44 = vld [vmem:[%s3615_s2 + $0x10] sm:$0xff] }
 0xbf0   :  { %v2890_v43 = vpop.eup %2889 }
 0xbf1   :  { %750 = vrot.lane.b32.xlu0 %v2890_v43, %s2982_s6  ;;  %v20_v43 = vld [vmem:[%s3615_s2 + $0x8] sm:$0xff] }
 0xbf2   :  { %v2892_v45 = vpop.eup %2891 }
 0xbf3   :  { %v741_v46 = vadd.f32 1.0, %v2892_v45  ;;  %v2684_v45 = vpack.c.bf16 %v20_v43, %v19_v42  ;;  %v1102_v43 = vld [vmem:[%s3615_s2 + $0x130] sm:$0xff] }
 0xbf5   :  { %2893 = vrcp.f32 %v741_v46  ;;  %v22_v46 = vld [vmem:[%s3615_s2 + $0x18] sm:$0xff]  ;;  %2685 = vmatpush1.bf16.msra.mxu0 %v2684_v45 }
 0xbf6   :  { %2686 = vmatprep.subr.bf16.mxu0 %v2979_v5 }
 0xbff   :  { %v2894_v47 = vpop.eup %2893 }
 0xc00   :  { %v748_v51 = vmul.f32 %v2894_v47, %v746_v50  ;;  %v25_v50 = vld [vmem:[%s3615_s2 + $0x30] sm:$0xff] }
 0xc63   :  { %v751_v48 = vpop.permute.xlu0 %750 }
 0xc64   :  { %v753_v49 = vmul.f32 %v2894_v47, %v751_v48  ;;  %v24_v48 = vld [vmem:[%s3615_s2 + $0x28] sm:$0xff] }
 0xc66   :  { %755 = vrot.lane.b32.xlu1 %v753_v49, %s2983_s7 }
 0xcd8   :  { %v756_v52 = vpop.permute.xlu1 %755 }
 0xcd9   :  { %v758_v53 = vadd.f32 %v756_v52, %v748_v51  ;;  %v26_v51 = vld [vmem:[%s3615_s2 + $0x38] sm:$0xff] }
 0xcdb   :  { %2895 = vtanh.f32 %v758_v53  ;;  %v853_v7 = vrot.slane %v758_v53, 4  ;;  %v2693_v53 = vpack.c.bf16 %v26_v51, %v25_v50  ;;  %v1185_v50 = vld [vmem:[%s3615_s2 + $0x158] sm:$0xff]  ;;  %v1186_v51 = vld [vmem:[%s3615_s2 + $0x160] sm:$0xff] }
 0xce5   :  { %v2896_v54 = vpop.eup %2895 }
 0xce6   :  { %761 = vrot.lane.b32.xlu0 %v2896_v54, %s2983_s7 }
 0xd58   :  { %v762_v55 = vpop.permute.xlu0 %761 }
 0xd59   :  { %v764_v56 = vmul.f32 %v2894_v47, %v762_v55  ;;  %v23_v47 = vld [vmem:[%s3615_s2 + $0x20] sm:$0xff] }
 0xd5a   :  { %v2690_v49 = vpack.c.bf16 %v24_v48, %v23_v47 }
 0xd5b   :  { %v765_v57 = vadd.f32 %v764_v56, %v662_v38  ;;  %767 = vrot.lane.b32.xlu1 %v764_v56, %s2984_s8 }
 0xdcd   :  { %v768_v58 = vpop.permute.xlu1 %767 }
 0xdce   :  { %2537 = vmatmul.mubr.msk.f32.vlgmr.msra.gmra.mrb[14].mxu1 %vm141_vm0, %v768_v58  ;;  %v28_v58 = vld [vmem:[%s3615_s2 + $0x48] sm:$0xff] }
 0xdcf   :  { %2747 = vmatpush3.bf16.msra.mxu1 %v3035_v8  ;;  %2543 = vmatprep.mubr.msk.f32.mxu1 %vm2980_vm1, %v2981_v11 }
 0xdd0   :  { %2748 = vmatprep.subr.bf16.mxu1 %v2979_v5 }
 0xea1   :  { %v837_v59 = vpop.f32.mrb[14].mxu1 }
 0xea2   :  { %v842_v60 = vrot.slane %v837_v59, 4  ;;  %v2538_v61 = vpop.f32.mrb[15].mxu1 }
 0xea3   :  { %v30_v61 = vld [vmem:[%s3615_s2 + $0x58] sm:$0xff] }
 0xea4   :  { %v844_v62 = vadd.f32 %v842_v60, %v3063_v19  ;;  %v29_v60 = vld [vmem:[%s3615_s2 + $0x50] sm:$0xff] }
 0xea6   :  { %2897 = vtanh.f32 %v844_v62  ;;  %v2333_v0 = vmul.f32 -1.442695, %v844_v62  ;;  %v2699_v62 = vpack.c.bf16 %v30_v61, %v29_v60 }
 0xea8   :  { %2899 = vpow2.f32 %v2333_v0  ;;  %v32_v0 = vld [vmem:[%s3615_s2 + $0x68] sm:$0xff] }
 0xeb0   :  { %v2898_v63 = vpop.eup %2897 }
 0xeb1   :  { %857 = vrot.lane.b32.xlu0 %v2898_v63, %s2982_s6  ;;  %v31_v63 = vld [vmem:[%s3615_s2 + $0x60] sm:$0xff] }
 0xeb2   :  { %v2900_v1 = vpop.eup %2899 }
 0xeb3   :  { %v848_v2 = vadd.f32 1.0, %v2900_v1  ;;  %v2702_v1 = vpack.c.bf16 %v32_v0, %v31_v63  ;;  %v1191_v63 = vld [vmem:[%s3615_s2 + $0x188] sm:$0xff]  ;;  %v1192_v0 = vld [vmem:[%s3615_s2 + $0x190] sm:$0xff] }
 0xeb5   :  { %2901 = vrcp.f32 %v848_v2  ;;  %v33_v2 = vld [vmem:[%s3615_s2 + $0x70] sm:$0xff] }
 0xebf   :  { %v2902_v3 = vpop.eup %2901 }
 0xec0   :  { %v855_v9 = vmul.f32 %v2902_v3, %v853_v7 }
 0xf23   :  { %v858_v4 = vpop.permute.xlu0 %857 }
 0xf24   :  { %v860_v6 = vmul.f32 %v2902_v3, %v858_v4 }
 0xf26   :  { %862 = vrot.lane.b32.xlu1 %v860_v6, %s2983_s7 }
 0xf98   :  { %v863_v10 = vpop.permute.xlu1 %862 }
 0xf99   :  { %v865_v12 = vadd.f32 %v863_v10, %v855_v9  ;;  %v35_v10 = vld [vmem:[%s3615_s2 + $0x80] sm:$0xff] }
 0xf9b   :  { %2903 = vtanh.f32 %v865_v12  ;;  %v959_v30 = vrot.slane %v865_v12, 4  ;;  %v36_v12 = vld [vmem:[%s3615_s2 + $0x88] sm:$0xff] }
 0xfa5   :  { %v2904_v19 = vpop.eup %2903 }
 0xfa6   :  { %868 = vrot.lane.b32.xlu0 %v2904_v19, %s2983_s7  ;;  %v2708_v19 = vpack.c.bf16 %v36_v12, %v35_v10 }
0x1018   :  { %v869_v13 = vpop.permute.xlu0 %868 }
0x1019   :  { %v871_v15 = vmul.f32 %v2902_v3, %v869_v13  ;;  %v34_v3 = vld [vmem:[%s3615_s2 + $0x78] sm:$0xff]  ;;  %v37_v13 = vld [vmem:[%s3615_s2 + $0x90] sm:$0xff] }
0x101a   :  { %v2705_v4 = vpack.c.bf16 %v34_v3, %v33_v2  ;;  %v2776_v2 = vpack.c.bf16 %v1192_v0, %v1191_v63  ;;  %v1194_v3 = vld [vmem:[%s3615_s2 + $0x1a0] sm:$0xff] }
0x101b   :  { %v873_v16 = vrot.slane %v871_v15, 4  ;;  %v38_v15 = vld [vmem:[%s3615_s2 + $0x98] sm:$0xff] }
0x101d   :  { %v875_v18 = vadd.f32 %v873_v16, %v765_v57  ;;  %876 = vrot.lane.b32.xlu1 %v873_v16, %s2984_s8  ;;  %v27_v57 = vld [vmem:[%s3615_s2 + $0x40] sm:$0xff]  ;;  %v2711_v16 = vpack.c.bf16 %v38_v15, %v37_v13  ;;  %v1196_v13 = vld [vmem:[%s3615_s2 + $0x1b0] sm:$0xff] }
0x101e   :  { %v2696_v59 = vpack.c.bf16 %v28_v58, %v27_v57  ;;  %v1189_v58 = vld [vmem:[%s3615_s2 + $0x178] sm:$0xff] }
0x108f   :  { %v877_v20 = vpop.permute.xlu1 %876 }
0x1090   :  { %2544 = vmatmul.mubr.msk.f32.vlgmr.msra.gmra.mrb[16].mxu1 %vm141_vm0, %v877_v20  ;;  %v40_v20 = vld [vmem:[%s3615_s2 + $0xa8] sm:$0xff] }
0x1091   :  { %2750 = vmatpush3.bf16.msra.mxu1 %v3035_v8  ;;  %2550 = vmatprep.mubr.msk.f32.mxu1 %vm2980_vm1, %v2981_v11 }
0x1092   :  { %2751 = vmatprep.subr.bf16.mxu1 %v2979_v5 }
0x1163   :  { %v946_v21 = vpop.f32.mrb[16].mxu1 }
0x1164   :  { %v950_v22 = vadd.f32 %v946_v21, %v3061_v17  ;;  %v2545_v23 = vpop.f32.mrb[17].mxu1  ;;  %v18_v21 = vld [vmem:[%s3613_s0] sm:$0xff] }
0x1166   :  { %2905 = vtanh.f32 %v950_v22  ;;  %v2335_v25 = vmul.f32 -1.442695, %v950_v22  ;;  %v51_v22 = vcombine.high %v18_v21, %v18_v21 }
0x1168   :  { %2907 = vpow2.f32 %v2335_v25  ;;  %2317 = vmatprep.mubr.msk.f32.mxu0 %vm52_vm2, %v51_v22  ;;  %v42_v25 = vld [vmem:[%s3615_s2 + $0xb8] sm:$0xff]  ;;  %vm1454_vm2 = vcmask 31744  }
0x1169   :  { %v2340_v22 = vld [vmem:[%s3615_s2 + $0x1b8] ss:$0 sm:$0xff] }
0x1170   :  { %v2906_v24 = vpop.eup %2905 }
0x1171   :  { %963 = vrot.lane.b32.xlu0 %v2906_v24, %s2982_s6  ;;  %v41_v24 = vld [vmem:[%s3615_s2 + $0xb0] sm:$0xff] }
0x1172   :  { %v2908_v26 = vpop.eup %2907 }
0x1173   :  { %v954_v27 = vadd.f32 1.0, %v2908_v26  ;;  %v2717_v26 = vpack.c.bf16 %v42_v25, %v41_v24 }
0x1175   :  { %2909 = vrcp.f32 %v954_v27  ;;  %v43_v27 = vld [vmem:[%s3615_s2 + $0xc0] sm:$0xff] }
0x117f   :  { %v2910_v28 = vpop.eup %2909 }
0x1180   :  { %v961_v31 = vmul.f32 %v2910_v28, %v959_v30 }
0x11e3   :  { %v964_v8 = vpop.permute.xlu0 %963 }
0x11e4   :  { %v966_v29 = vmul.f32 %v2910_v28, %v964_v8 }
0x11e6   :  { %968 = vrot.lane.b32.xlu1 %v966_v29, %s2983_s7 }
0x1258   :  { %v969_v32 = vpop.permute.xlu1 %968 }
0x1259   :  { %v3130_v33 = vadd.f32 %v969_v32, %v961_v31 }
0x125b   :  { %2911 = vtanh.f32 %v3130_v33  ;;  %v1066_v29 = vrot.slane %v3130_v33, 4  ;;  %v1099_v33 = vld [vmem:[%s3615_s2 + $0x118] sm:$0xff] }
0x1265   :  { %v2912_v34 = vpop.eup %2911 }
0x1266   :  { %974 = vrot.lane.b32.xlu0 %v2912_v34, %s2983_s7  ;;  %v1096_v34 = vld [vmem:[%s3615_s2 + $0x100] sm:$0xff] }
0x12d8   :  { %v975_v14 = vpop.permute.xlu0 %974 }
0x12d9   :  { %v977_v35 = vmul.f32 %v2910_v28, %v975_v14  ;;  %v44_v28 = vld [vmem:[%s3615_s2 + $0xc8] sm:$0xf] }
0x12da   :  { %v2720_v8 = vpack.c.bf16 %v44_v28, %v43_v27  ;;  %v1097_v14 = vld [vmem:[%s3615_s2 + $0x108] sm:$0xff] }
0x12db   :  { %v3134_v36 = vadd.f32 %v977_v35, %v875_v18  ;;  %980 = vrot.lane.b32.xlu1 %v977_v35, %s2984_s8  ;;  %v39_v18 = vld [vmem:[%s3615_s2 + $0xa0] sm:$0xff]  ;;  %v1098_v35 = vld [vmem:[%s3615_s2 + $0x110] sm:$0xff] }
0x12dc   :  { %v2714_v23 = vpack.c.bf16 %v40_v20, %v39_v18 }
0x134d   :  { %v981_v37 = vpop.permute.xlu1 %980 }
0x134e   :  { %2551 = vmatmul.mubr.msk.f32.vlgmr.msra.gmra.mrb[18].mxu1 %vm141_vm0, %v981_v37  ;;  %v2752_v37 = vpack.c.bf16 %v1097_v14, %v1096_v34 }
0x134f   :  { %2573 = vmatprep.mubr.msk.f32.mxu1 %vm2980_vm1, %v2981_v11 }
0x1350   :  { %2753 = vmatpush3.bf16.msra.mxu1 %v2752_v37 }
0x1351   :  { %2754 = vmatprep.subr.bf16.mxu1 %v2979_v5 }
0x1421   :  { %v1050_v38 = vpop.f32.mrb[18].mxu1 }
0x1422   :  { %v1055_v39 = vrot.slane %v1050_v38, 4  ;;  %v2552_v40 = vpop.f32.mrb[19].mxu1  ;;  %v2755_v38 = vpack.c.bf16 %v1099_v33, %v1098_v35 }
0x1423   :  { %v1100_v40 = vld [vmem:[%s3615_s2 + $0x120] sm:$0xff] }
0x1424   :  { %v1057_v41 = vadd.f32 %v1055_v39, %v3061_v17  ;;  %v2687_v17 = vpack.c.bf16 %v22_v46, %v21_v44  ;;  %2756 = vmatpush3.bf16.msra.mxu1 %v2755_v38  ;;  %v1103_v44 = vld [vmem:[%s3615_s2 + $0x138] sm:$0xff]  ;;  %v1104_v46 = vld [vmem:[%s3615_s2 + $0x140] sm:$0xff] }
0x1425   :  { %2757 = vmatprep.subr.bf16.mxu1 %v2979_v5  ;;  %v2761_v45 = vpack.c.bf16 %v1103_v44, %v1102_v43 }
0x1426   :  { %2913 = vtanh.f32 %v1057_v41  ;;  %2688 = vmatpush1.bf16.msra.mxu0 %v2687_v17  ;;  %v2337_v54 = vmul.f32 -1.442695, %v1057_v41  ;;  %v1101_v41 = vld [vmem:[%s3615_s2 + $0x128] sm:$0xff] }
0x1427   :  { %2689 = vmatprep.subr.bf16.mxu0 %v2979_v5  ;;  %v2758_v42 = vpack.c.bf16 %v1101_v41, %v1100_v40  ;;  %v1105_v17 = vld [vmem:[%s3615_s2 + $0x148] sm:$0xff] }
0x1428   :  { %2915 = vpow2.f32 %v2337_v54  ;;  %v2764_v47 = vpack.c.bf16 %v1105_v17, %v1104_v46  ;;  %v1188_v54 = vld [vmem:[%s3615_s2 + $0x170] sm:$0xff] }
0x1429   :  { %2759 = vmatpush3.bf16.msra.mxu1 %v2758_v42 }
0x142a   :  { %2691 = vmatpush1.bf16.msra.mxu0 %v2690_v49  ;;  %2760 = vmatprep.subr.bf16.mxu1 %v2979_v5 }
0x142b   :  { %2692 = vmatprep.subr.bf16.mxu0 %v2979_v5 }
0x142d   :  { %2762 = vmatpush3.bf16.msra.mxu1 %v2761_v45 }
0x142e   :  { %2694 = vmatpush1.bf16.msra.mxu0 %v2693_v53  ;;  %2763 = vmatprep.subr.bf16.mxu1 %v2979_v5  ;;  %v2767_v53 = vpack.c.bf16 %v1186_v51, %v1185_v50 }
0x142f   :  { %2695 = vmatprep.subr.bf16.mxu0 %v2979_v5 }
0x1430   :  { %v2914_v52 = vpop.eup %2913 }
0x1431   :  { %1070 = vrot.lane.b32.xlu0 %v2914_v52, %s2982_s6  ;;  %2765 = vmatpush3.bf16.msra.mxu1 %v2764_v47  ;;  %v1187_v52 = vld [vmem:[%s3615_s2 + $0x168] sm:$0xff] }
0x1432   :  { %v2916_v55 = vpop.eup %2915  ;;  %2697 = vmatpush1.bf16.msra.mxu0 %v2696_v59  ;;  %2603 = vmatprep.subr.mxu1 %v2981_v11  ;;  %v1190_v59 = vld [vmem:[%s3615_s2 + $0x180] sm:$0xff] }
0x1433   :  { %v1061_v56 = vadd.f32 1.0, %v2916_v55  ;;  %2698 = vmatprep.subr.bf16.mxu0 %v2979_v5  ;;  %v2773_v61 = vpack.c.bf16 %v1190_v59, %v1189_v58  ;;  %v1404_v59 = vlaneseq }
0x1435   :  { %2917 = vrcp.f32 %v1061_v56  ;;  %v2770_v56 = vpack.c.bf16 %v1188_v54, %v1187_v52 }
0x1436   :  { %2700 = vmatpush1.bf16.msra.mxu0 %v2699_v62 }
0x1437   :  { %2701 = vmatprep.subr.bf16.mxu0 %v2979_v5 }
0x143a   :  { %2703 = vmatpush1.bf16.msra.mxu0 %v2702_v1 }
0x143b   :  { %2704 = vmatprep.subr.bf16.mxu0 %v2979_v5 }
0x143e   :  { %2706 = vmatpush1.bf16.msra.mxu0 %v2705_v4 }
0x143f   :  { %v3197_v6 = vpop.eup %2917  ;;  %2707 = vmatprep.subr.bf16.mxu0 %v2979_v5 }
0x1440   :  { %v1068_v30 = vmul.f32 %v3197_v6, %v1066_v29 }
0x1442   :  { %2709 = vmatpush1.bf16.msra.mxu0 %v2708_v19  ;;  %v1195_v19 = vld [vmem:[%s3615_s2 + $0x1a8] sm:$0xff] }
0x1443   :  { %2710 = vmatprep.subr.bf16.mxu0 %v2979_v5  ;;  %v2782_v15 = vpack.c.bf16 %v1196_v13, %v1195_v19  ;;  %v1418_v13 = vld [vmem:[%s3615_s2 + $0x1c8] sm:$0xff] }
0x1446   :  { %2712 = vmatpush1.bf16.msra.mxu0 %v2711_v16  ;;  %v2338_v16 = vld [vmem:[%s3615_s2 + $0x150] ss:$0 sm:$0xff] }
0x1447   :  { %2713 = vmatprep.subr.bf16.mxu0 %v2979_v5 }
0x144a   :  { %2715 = vmatpush1.bf16.msra.mxu0 %v2714_v23 }
0x144b   :  { %2716 = vmatprep.subr.bf16.mxu0 %v2979_v5 }
0x144e   :  { %2718 = vmatpush1.bf16.msra.mxu0 %v2717_v26 }
0x144f   :  { %2719 = vmatprep.subr.bf16.mxu0 %v2979_v5 }
0x1452   :  { %2722 = vmatpush1.bf16.msk.msra.mxu0 %vm2721_vm5, %v2720_v8 }
0x1453   :  { %2766 = vmatprep.subr.bf16.mxu0 %v2979_v5 }
0x1455   :  { %124 = vmatmul.mubr.f32.vlgmr.msra.gmra.mrb[0].mxu0 %v18_v21 }
0x1456   :  { %2600 = vmatprep.mubr.msk.f32.mxu0 %vm2980_vm1, %v2981_v11  ;;  %2768 = vmatpush3.bf16.msra.mxu0 %v2767_v53 }
0x1457   :  { %2769 = vmatprep.subr.bf16.mxu0 %v2979_v5 }
0x145a   :  { %2771 = vmatpush3.bf16.msra.mxu0 %v2770_v56 }
0x145b   :  { %2772 = vmatprep.subr.bf16.mxu0 %v2979_v5 }
0x145e   :  { %2774 = vmatpush3.bf16.msra.mxu0 %v2773_v61  ;;  %v1407_v61 = vshrl.u32 %v1404_v59, 7 }
0x145f   :  { %2775 = vmatprep.subr.bf16.mxu0 %v2979_v5 }
0x1462   :  { %2777 = vmatpush3.bf16.msra.mxu0 %v2776_v2 }
0x1463   :  { %2778 = vmatprep.subr.bf16.mxu0 %v2979_v5 }
0x14a3   :  { %v1071_v7 = vpop.permute.xlu0 %1070 }
0x14a4   :  { %v1073_v9 = vmul.f32 %v3197_v6, %v1071_v7 }
0x14a6   :  { %1075 = vrot.lane.b32.xlu1 %v1073_v9, %s2983_s7 }
0x1518   :  { %v1076_v31 = vpop.permute.xlu1 %1075 }
0x1519   :  { %v1078_v32 = vadd.f32 %v1076_v31, %v1068_v30 }
0x151b   :  { %2919 = vtanh.f32 %v1078_v32 }
0x1525   :  { %v2920_v39 = vpop.eup %2919 }
0x1526   :  { %1081 = vrot.lane.b32.xlu0 %v2920_v39, %s2983_s7 }
0x1528   :  { %v125_v48 = vpop.f32.mrb[0].mxu0 }
0x1529   :  { %v127_v49 = vpop.f32.mrb[1].mxu0 }
0x1598   :  { %v1082_v55 = vpop.permute.xlu0 %1081 }
0x1599   :  { %v1084_v57 = vmul.f32 %v3197_v6, %v1082_v55  ;;  %v2315_v6 = vld [vmem:[%s3615_s2 + $0xd0] ss:$0 sm:$0xff] }
0x159a   :  { %v126_v7 = vadd.f32 %v2315_v6, %v125_v48 }
0x159b   :  { %v1086_v60 = vrot.slane %v1084_v57, 4 }
0x159c   :  { %v129_v9 = vmax.f32 %v126_v7, 0.0 }
0x159d   :  { %v1088_v62 = vadd.f32 %v1086_v60, %v3134_v36  ;;  %v1193_v36 = vld [vmem:[%s3615_s2 + $0x198] sm:$0xff]  ;;  %v1405_v60 = vand.u32 127, %v1404_v59  ;;  %v1447_v59 = vld [vmem:[%s3615_s2 + $0x2b0] sm:$0xff] }
0x159e   :  { %v2779_v4 = vpack.c.bf16 %v1194_v3, %v1193_v36 }
0x159f   :  { %v1089_v1 = vmul.f32 0.125, %v1088_v62  ;;  %v1408_v62 = vsub.s32 %v1405_v60, %v1407_v61  ;;  %v1448_v60 = vld [vmem:[%s3615_s2 + $0x2b8] sm:$0xff] }
0x15a0   :  { %2780 = vmatpush3.bf16.msra.mxu0 %v2779_v4 }
0x15a1   :  { %1091 = vrot.lane.b32.xlu1 %v1089_v1, %s2986_s21  ;;  %2781 = vmatprep.subr.bf16.mxu0 %v2979_v5 }
0x15a4   :  { %2783 = vmatpush3.bf16.msra.mxu0 %v2782_v15  ;;  %v1435_v15 = vld [vmem:[%s3615_s2 + $0x250] sm:$0xff] }
0x15a5   :  { %2816 = vmatprep.subr.bf16.mxu0 %v2979_v5 }
0x1613   :  { %v1092_v10 = vpop.permute.xlu1 %1091 }
0x1614   :  { %v1095_v12 = vsel %vm1094_vm6, %v129_v9, %v1092_v10  ;;  %v1433_v9 = vld [vmem:[%s3615_s2 + $0x240] sm:$0xff]  ;;  %v1434_v10 = vld [vmem:[%s3615_s2 + $0x248] sm:$0xff] }
0x1615   :  { %2574 = vmatmul.mubr.msk.f32.vlgmr.msra.gmra.mrb[20].mxu1 %vm1111_vm7, %v1095_v12  ;;  %v1417_v12 = vld [vmem:[%s3615_s2 + $0x1c0] sm:$0xff]  ;;  %v2784_v19 = vpack.c.bf16 %v1434_v10, %v1433_v9 }
0x1616   :  { %2605 = vmatprep.mubr.msk.f32.mxu1 %vm2980_vm1, %v2981_v11 }
0x16e8   :  { %v1181_v18 = vpop.f32.mrb[20].mxu1 }
0x16e9   :  { %v3335_v20 = vadd.f32 %v2338_v16, %v1181_v18  ;;  %v2575_v21 = vpop.f32.mrb[21].mxu1  ;;  %v1436_v16 = vld [vmem:[%s3615_s2 + $0x258] sm:$0xff]  ;;  %v2786_v18 = vpack.c.bf16 %v1418_v13, %v1417_v12 }
0x16ea   :  { %v2788_v21 = vpack.c.bf16 %v1436_v16, %v1435_v15  ;;  %v2349_v16 = vld [vmem:[%s3615_s2 + $0x2e0] ss:$0 sm:$0xff] }
0x16eb   :  { %2601 = vmatmul.mubr.msk.f32.vlgmr.msra.gmra.mrb[2].mxu0 %vm1202_vm8, %v3335_v20 }
0x16ec   :  { %2626 = vmatprep.mubr.msk.f32.mxu0 %vm2980_vm1, %v2981_v11 }
0x17be   :  { %v1272_v23 = vpop.f32.mrb[2].mxu0 }
0x17bf   :  { %v1273_v24 = vadd.f32 %v2340_v22, %v1272_v23  ;;  %v2602_v25 = vpop.f32.mrb[3].mxu0  ;;  %v1419_v22 = vld [vmem:[%s3615_s2 + $0x1d0] sm:$0xff]  ;;  %v1420_v23 = vld [vmem:[%s3615_s2 + $0x1d8] sm:$0xff] }
0x17c0   :  { %v1438_v25 = vld [vmem:[%s3615_s2 + $0x268] sm:$0xff] }
0x17c1   :  { %v2342_v26 = vmul.f32 -1.442695, %v1273_v24  ;;  %v1437_v24 = vld [vmem:[%s3615_s2 + $0x260] sm:$0xff] }
0x17c3   :  { %2921 = vpow2.f32 %v2342_v26  ;;  %v2790_v26 = vpack.c.bf16 %v1420_v23, %v1419_v22 }
0x17cd   :  { %v2922_v27 = vpop.eup %2921 }
0x17ce   :  { %v1279_v28 = vadd.f32 1.0, %v2922_v27  ;;  %v2792_v27 = vpack.c.bf16 %v1438_v25, %v1437_v24 }
0x17d0   :  { %2923 = vrcp.f32 %v1279_v28  ;;  %v1421_v28 = vld [vmem:[%s3615_s2 + $0x1e0] sm:$0xff] }
0x17da   :  { %v2924_v8 = vpop.eup %2923 }
0x17db   :  { %v1283_v29 = vsel %vm1282_vm9, %v2924_v8, -inf  ;;  %v1300_v37 = vsel %vm1282_vm9, %v2924_v8, 0.0  ;;  %vm1297_vm12 = vcmp.gt.f32.partialorder %v2924_v8, 0.2 }
0x17dc   :  { %1284 = vmax.xlane.f32.xlu0 %v1283_v29  ;;  %v1301_v33 = vrot.slane %v1300_v37, 4  ;;  %v1439_v29 = vld [vmem:[%s3615_s2 + $0x270] sm:$0xff] }
0x17de   :  { %v1302_v38 = vadd.f32 %v1301_v33, %v1300_v37  ;;  %v1424_v37 = vld [vmem:[%s3615_s2 + $0x1f8] sm:$0xff]  ;;  %v1441_v33 = vld [vmem:[%s3615_s2 + $0x280] sm:$0xff] }
0x17e0   :  { %v1303_v39 = vrot.slane %v1302_v38, 2 }
0x17e2   :  { %v1304_v40 = vadd.f32 %v1303_v39, %v1302_v38  ;;  %v1442_v39 = vld [vmem:[%s3615_s2 + $0x288] sm:$0xff] }
0x17e4   :  { %v1305_v41 = vrot.slane %v1304_v40, 1 }
0x17e6   :  { %v1306_v42 = vadd.f32 %v1305_v41, %v1304_v40  ;;  %v1451_v40 = vld [vmem:[%s3615_s2 + $0x2d0] sm:$0xff]  ;;  %v1452_v41 = vld [vmem:[%s3615_s2 + $0x2d8] sm:$0xff] }
0x17e8   :  { %v1308_v44 = vmul.f32 0.25, %v1306_v42  ;;  %v2820_v42 = vpack.c.bf16 %v1452_v41, %v1451_v40  ;;  %v1773_v40 = vld [vmem:[%s3615_s2 + $0x340] sm:$0xff] }
0x1869   :  { %v1285_v30 = vpop.xlane.xlu0 %1284 }
0x186a   :  { %vm1286_vm10 = vcmp.ge.f32.partialorder %v2924_v8, %v1285_v30  ;;  %v1440_v30 = vld [vmem:[%s3615_s2 + $0x278] sm:$0xff] }
0x186b   :  { %v1287_v31 = vsel %vm1286_vm10, -inf, %v2924_v8 }
0x186c   :  { %v1288_v32 = vsel %vm1282_vm9, %v1287_v31, -inf }
0x186d   :  { %1289 = vmax.xlane.f32.xlu1 %v1288_v32  ;;  %v1449_v32 = vld [vmem:[%s3615_s2 + $0x2c0] sm:$0xff] }
0x18fa   :  { %v1290_v34 = vpop.xlane.xlu1 %1289 }
0x18fb   :  { %vm1291_vm11 = vcmp.ge.f32.partialorder %v1287_v31, %v1290_v34  ;;  %v1450_v34 = vld [vmem:[%s3615_s2 + $0x2c8] sm:$0xff] }
0x18fc   :  { %v1292_v14 = vsel %vm1291_vm11, -inf, %v1287_v31  ;;  %v2817_v38 = vpack.c.bf16 %v1450_v34, %v1449_v32  ;;  %v1768_v34 = vld [vmem:[%s3615_s2 + $0x318] sm:$0xff] }
0x18fd   :  { %v1293_v35 = vsel %vm1282_vm9, %v1292_v14, -inf  ;;  %v2796_v14 = vpack.c.bf16 %v1440_v30, %v1439_v29  ;;  %v1766_v30 = vld [vmem:[%s3615_s2 + $0x308] sm:$0xff] }
0x18fe   :  { %1294 = vmax.xlane.f32.xlu0 %v1293_v35  ;;  %v1423_v35 = vld [vmem:[%s3615_s2 + $0x1f0] sm:$0xff]  ;;  %2818 = vmatpush3.bf16.msra.mxu0 %v2817_v38 }
0x18ff   :  { %2819 = vmatprep.subr.bf16.mxu0 %v2979_v5 }
0x1902   :  { %2821 = vmatpush3.bf16.msra.mxu0 %v2820_v42 }
0x1903   :  { %2629 = vmatprep.subr.mxu0 %v2981_v11 }
0x198b   :  { %v1295_v43 = vpop.xlane.xlu0 %1294 }
0x198c   :  { %vm1296_vm13 = vcmp.ge.f32.partialorder %v2924_v8, %v1295_v43  ;;  %v2798_v43 = vpack.c.bf16 %v1424_v37, %v1423_v35  ;;  %v1770_v37 = vld [vmem:[%s3615_s2 + $0x328] sm:$0xff] }
0x198d   :  { %vm1298_vm15 = vmand %vm1296_vm13, %vm1297_vm12 }
0x198e   :  { %v1299_v45 = vsel %vm1298_vm15, %v2924_v8, 0.0  ;;  %v1422_v8 = vld [vmem:[%s3615_s2 + $0x1e8] sm:$0xff] }
0x198f   :  { %v3349_v46 = vsel %vm1282_vm9, %v1299_v45, 0.0  ;;  %2604 = vmatpush3.xpose.msk.msra.mxu1 %vm1319_vm14, %v1299_v45  ;;  %v1396_v17 = vmul.f32 %v1308_v44, %v1299_v45  ;;  %v2794_v31 = vpack.c.bf16 %v1422_v8, %v1421_v28  ;;  %v2800_v44 = vpack.c.bf16 %v1442_v39, %v1441_v33  ;;  %v1764_v28 = vld [vmem:[%s3615_s2 + $0x2f8] sm:$0xff]  ;;  %v1771_v33 = vld [vmem:[%s3615_s2 + $0x330] sm:$0xff] }
0x1990   :  { %v1310_v47 = vrot.slane %v3349_v46, 4  ;;  %2608 = vmatprep.subr.mxu1 %v2981_v11  ;;  %v2835_v38 = vpack.c.bf16 %v1771_v33, %v1770_v37  ;;  %v1772_v39 = vld [vmem:[%s3615_s2 + $0x338] sm:$0xff] }
0x1991   :  { %v1397_v48 = vsel %vm1282_vm9, %v1396_v17, 0.0  ;;  %v1426_v17 = vld [vmem:[%s3615_s2 + $0x208] sm:$0xff]  ;;  %v2838_v41 = vpack.c.bf16 %v1773_v40, %v1772_v39 }
0x1992   :  { %v1311_v49 = vadd.f32 %v1310_v47, %v3349_v46  ;;  %1398 = vadd.xlane.f32.xlu0 %v1397_v48  ;;  %v1443_v47 = vld [vmem:[%s3615_s2 + $0x290] sm:$0xff]  ;;  %v1444_v48 = vld [vmem:[%s3615_s2 + $0x298] sm:$0xff] }
0x1994   :  { %v1312_v50 = vrot.slane %v1311_v49, 2 }
0x1996   :  { %v1313_v51 = vadd.f32 %v1312_v50, %v1311_v49  ;;  %v2804_v50 = vpack.c.bf16 %v1444_v48, %v1443_v47 }
0x1998   :  { %v1314_v52 = vrot.slane %v1313_v51, 1 }
0x199a   :  { %v1315_v53 = vadd.f32 %v1314_v52, %v1313_v51  ;;  %v1427_v51 = vld [vmem:[%s3615_s2 + $0x210] sm:$0xff]  ;;  %v1428_v52 = vld [vmem:[%s3615_s2 + $0x218] sm:$0xff] }
0x199c   :  { %v1316_v54 = vadd.f32 1e-08, %v1315_v53  ;;  %v1445_v53 = vld [vmem:[%s3615_s2 + $0x2a0] sm:$0xff] }
0x199e   :  { %2925 = vrcp.f32 %v1316_v54  ;;  %v1446_v54 = vld [vmem:[%s3615_s2 + $0x2a8] sm:$0xff] }
0x19a8   :  { %v2926_v55 = vpop.eup %2925 }
0x19a9   :  { %v1318_v56 = vmul.f32 %v2926_v55, %v1299_v45  ;;  %v1425_v45 = vld [vmem:[%s3615_s2 + $0x200] sm:$0xff]  ;;  %v2806_v55 = vpack.c.bf16 %v1428_v52, %v1427_v51  ;;  %v2355_v52 = vld [vmem:[%s3615_s2 + $0x348] ss:$0 sm:$0xff] }
0x19aa   :  { %v2802_v49 = vpack.c.bf16 %v1426_v17, %v1425_v45 }
0x19ab   :  { %2606 = vmatmul.mubr.msk.f32.vlgmr.msra.gmra.mrb[22].mxu1 %vm1319_vm14, %v1318_v56  ;;  %v2808_v56 = vpack.c.bf16 %v1446_v54, %v1445_v53 }
0x19ac   :  { %2609 = vmatpush3.msk.msra.mxu1 %vm55_vm3, %v3335_v20  ;;  %2610 = vmatprep.mubr.msk.f32.mxu1 %vm2980_vm1, %v2981_v11 }
0x19ad   :  { %2613 = vmatprep.subr.mxu1 %v2981_v11 }
0x1a1f   :  { %v1399_v57 = vpop.xlane.xlu0 %1398 }
0x1a20   :  { %v1400_v58 = vadd.f32 1e-08, %v1399_v57  ;;  %v1429_v57 = vld [vmem:[%s3615_s2 + $0x220] sm:$0xff] }
0x1a22   :  { %2927 = vrsqrt.f32 %v1400_v58  ;;  %v1430_v58 = vld [vmem:[%s3615_s2 + $0x228] sm:$0xff] }
0x1a23   :  { %v2810_v61 = vpack.c.bf16 %v1430_v58, %v1429_v57  ;;  %v2091_v57 = vld [vmem:[%s3615_s2 + $0x368] sm:$0xff]  ;;  %v2357_v58 = vld [vmem:[%s3615_s2 + $0x360] ss:$0 sm:$0xff] }
0x1a2c   :  { %v2928_v63 = vpop.eup %2927 }
0x1a2d   :  { %v1409_v2 = vrot.slane %v2928_v63, %v1408_v62  ;;  %v2812_v62 = vpack.c.bf16 %v1448_v60, %v1447_v59 }
0x1a7e   :  { %v3362_v0 = vpop.f32.mrb[22].mxu1 }
0x1a7f   :  { %v1402_v1 = vmul.f32 %v2928_v63, %v3362_v0  ;;  %v2607_v36 = vpop.f32.mrb[23].mxu1  ;;  %v1431_v63 = vld [vmem:[%s3615_s2 + $0x230] sm:$0xff] }
0x1a81   :  { %v1415_v3 = vmul.f32 %v1409_v2, %v1402_v1  ;;  %v1432_v1 = vld [vmem:[%s3615_s2 + $0x238] sm:$0xff] }
0x1a82   :  { %v2814_v2 = vpack.c.bf16 %v1432_v1, %v1431_v63 }
0x1a83   :  { %v3365_v4 = vsub.f32 0.0, %v1415_v3 }
0x1a85   :  { %2611 = vmatmul.mubr.msk.f32.vlgmr.msra.gmra.mrb[24].mxu1 %vm1454_vm2, %v3365_v4 }
0x1a86   :  { %2615 = vmatprep.mubr.msk.f32.mxu1 %vm2980_vm1, %v2981_v11 }
0x1b58   :  { %v1526_v6 = vpop.f32.mrb[24].mxu1 }
0x1b59   :  { %1605 = vrot.lane.b32.xlu1 %v1526_v6, %s2984_s8  ;;  %v2612_v7 = vpop.f32.mrb[25].mxu1  ;;  %2614 = vmatpush3.msk.msra.mxu1 %vm55_vm3, %v1526_v6 }
0x1b5a   :  { %2616 = vmatmul.mubr.msk.f32.vlgmr.msra.gmra.mrb[26].mxu1 %vm1454_vm2, %v3365_v4  ;;  %2785 = vmatprep.subr.bf16.mxu1 %v2784_v19 }
0x1b5b   :  { %2787 = vmatpush3.bf16.msra.mxu1 %v2786_v18 }
0x1b5c   :  { %2789 = vmatprep.subr.bf16.mxu1 %v2788_v21 }
0x1b5f   :  { %2791 = vmatpush3.bf16.msra.mxu1 %v2790_v26  ;;  %v1762_v26 = vld [vmem:[%s3615_s2 + $0x2e8] sm:$0xff] }
0x1b60   :  { %2793 = vmatprep.subr.bf16.mxu1 %v2792_v27  ;;  %v1763_v27 = vld [vmem:[%s3615_s2 + $0x2f0] sm:$0xff] }
0x1b61   :  { %v2823_v8 = vpack.c.bf16 %v1763_v27, %v1762_v26 }
0x1b63   :  { %2795 = vmatpush3.bf16.msra.mxu1 %v2794_v31  ;;  %v1767_v31 = vld [vmem:[%s3615_s2 + $0x310] sm:$0xff] }
0x1b64   :  { %2797 = vmatprep.subr.bf16.mxu1 %v2796_v14  ;;  %v2829_v32 = vpack.c.bf16 %v1767_v31, %v1766_v30  ;;  %v1769_v14 = vld [vmem:[%s3615_s2 + $0x320] sm:$0xff] }
0x1b65   :  { %v2832_v35 = vpack.c.bf16 %v1769_v14, %v1768_v34 }
0x1b67   :  { %2799 = vmatpush3.bf16.msra.mxu1 %v2798_v43 }
0x1b68   :  { %2801 = vmatprep.subr.bf16.mxu1 %v2800_v44 }
0x1b6b   :  { %2803 = vmatpush3.bf16.msra.mxu1 %v2802_v49 }
0x1b6c   :  { %2805 = vmatprep.subr.bf16.mxu1 %v2804_v50  ;;  %v2010_v50 = vld [vmem:[%s3615_s2 + $0x350] sm:$0xff] }
0x1b6f   :  { %2807 = vmatpush3.bf16.msra.mxu1 %v2806_v55 }
0x1b70   :  { %2809 = vmatprep.subr.bf16.mxu1 %v2808_v56 }
0x1b73   :  { %2811 = vmatpush3.bf16.msra.mxu1 %v2810_v61 }
0x1b74   :  { %2813 = vmatprep.subr.bf16.mxu1 %v2812_v62 }
0x1b77   :  { %2815 = vmatpush3.bf16.msra.mxu1 %v2814_v2 }
0x1b78   :  { %2840 = vmatprep.subr.bf16.mxu1 %v2979_v5 }
0x1bcb   :  { %v1606_v9 = vpop.permute.xlu1 %1605 }
0x1bcc   :  { %v1612_v19 = vsel %vm1202_vm8, %v3335_v20, %v1606_v9 }
0x1c2d   :  { %v1599_v36 = vpop.f32.mrb[26].mxu1 }
0x1c2e   :  { %v1603_v3 = vmul.f32 2.0, %v1599_v36  ;;  %v2617_v6 = vpop.f32.mrb[27].mxu1 }
0x1c30   :  { %v1604_v7 = vsub.f32 %v1603_v3, %v3335_v20 }
0x1c32   :  { %1609 = vrot.lane.b32.xlu0 %v1604_v7, %s2987_s27 }
0x1c51   :  { %2171 = vadd.xlane.f32.xlu0 %v3349_v46 }
0x1ca4   :  { %v1610_v10 = vpop.permute.xlu0 %1609 }
0x1ca5   :  { %2627 = vmatmul.mubr.msk.f32.vlgmr.msra.gmra.mrb[4].mxu0 %vm1618_vm4, %v1610_v10  ;;  %v1613_v12 = vsel %vm1094_vm6, %v1606_v9, %v1610_v10 }
0x1ca6   :  { %1685 = vmatprep.mubr.f32.mxu1 %v1613_v12  ;;  %2631 = vmatprep.mubr.msk.f32.mxu0 %vm2980_vm1, %v2981_v11  ;;  %v2359_v12 = vld [vmem:[%s3615_s2 + $0x370] ss:$0 sm:$0xff] }
0x1ca7   :  { %1686 = vmatmul.mubr.f32.vlgmr.msra.gmra.mrb[28].mxu1 %v1612_v19 }
0x1ca8   :  { %2670 = vmatprep.mubr.msk.f32.mxu1 %vm2980_vm1, %v2981_v11 }
0x1cde   :  { %v2172_v63 = vpop.xlane.xlu0 %2171 }
0x1cdf   :  { %v2173_v1 = vadd.f32 1e-08, %v2172_v63 }
0x1d78   :  { %v1757_v13 = vpop.f32.mrb[4].mxu0 }
0x1d79   :  { %v2628_v46 = vpop.f32.mrb[5].mxu0 }
0x1d7a   :  { %v2455_v15 = vpop.f32.mrb[28].mxu1 }
0x1d7b   :  { %v2456_v18 = vpop.f32.mrb[29].mxu1 }
0x1d7c   :  { %v2457_v21 = vadd.f32 %v2456_v18, %v2455_v15 }
0x1d7e   :  { %v1688_v22 = vadd.f32 %v2457_v21, %v2349_v16 }
0x1d80   :  { %v1758_v23 = vadd.f32 %v1757_v13, %v1688_v22 }
0x1d82   :  { %v1761_v20 = vmax.f32 %v1758_v23, 0.0 }
0x1d84   :  { %2630 = vmatpush3.msk.msra.mxu0 %vm55_vm3, %v1761_v20 }
0x1d85   :  { %2632 = vmatmul.mubr.msk.f32.vlgmr.msra.gmra.mrb[6].mxu0 %vm1454_vm2, %v3365_v4  ;;  %2634 = vmatprep.subr.mxu0 %v2981_v11 }
0x1d86   :  { %2636 = vmatprep.mubr.msk.f32.mxu0 %vm2980_vm1, %v2981_v11 }
0x1e58   :  { %v1844_v24 = vpop.f32.mrb[6].mxu0 }
0x1e59   :  { %1923 = vrot.lane.b32.xlu1 %v1844_v24, %s2986_s21  ;;  %v2633_v25 = vpop.f32.mrb[7].mxu0  ;;  %2635 = vmatpush3.msk.msra.mxu0 %vm55_vm3, %v1844_v24 }
0x1e5a   :  { %2637 = vmatmul.mubr.msk.f32.vlgmr.msra.gmra.mrb[8].mxu0 %vm1454_vm2, %v3365_v4  ;;  %2822 = vmatprep.subr.bf16.mxu0 %v2979_v5  ;;  %v1765_v4 = vld [vmem:[%s3615_s2 + $0x300] sm:$0xff] }
0x1e5b   :  { %2663 = vmatprep.mubr.msk.f32.mxu0 %vm2980_vm1, %v2981_v11  ;;  %2824 = vmatpush3.bf16.msra.mxu0 %v2823_v8  ;;  %v2826_v29 = vpack.c.bf16 %v1765_v4, %v1764_v28 }
0x1e5c   :  { %2825 = vmatprep.subr.bf16.mxu0 %v2979_v5 }
0x1e5f   :  { %2827 = vmatpush3.bf16.msra.mxu0 %v2826_v29 }
0x1e60   :  { %2828 = vmatprep.subr.bf16.mxu0 %v2979_v5 }
0x1e63   :  { %2830 = vmatpush3.bf16.msra.mxu0 %v2829_v32 }
0x1e64   :  { %2831 = vmatprep.subr.bf16.mxu0 %v2979_v5 }
0x1e67   :  { %2833 = vmatpush3.bf16.msra.mxu0 %v2832_v35 }
0x1e68   :  { %2834 = vmatprep.subr.bf16.mxu0 %v2979_v5 }
0x1e6b   :  { %2836 = vmatpush3.bf16.msra.mxu0 %v2835_v38 }
0x1e6c   :  { %2837 = vmatprep.subr.bf16.mxu0 %v2979_v5  ;;  %v2011_v5 = vld [vmem:[%s3615_s2 + $0x358] sm:$0xff]  ;;  %s2988_s2 = smov [#allocation2]  }
0x1e6d   :  { %v2841_v51 = vpack.c.bf16 %v2011_v5, %v2010_v50  ;;  %s2293_s10 = sshll.u32 %s2988_s2, 4  ;;  %s2294_s10 = int_to_ptr.vmem [resolvable:$true] %s2293_s10 }
0x1e6e   :  { %s2931_s11 = scalar_lea.vmem %s2294_s10, 64  ;;  %p2936_p1 = scmp.lt.s32.totalorder %s2294_s10, %s2294_s10 }
0x1e6f   :  { %2839 = vmatpush3.bf16.msra.mxu0 %v2838_v41  ;;  %2842 = vmatpush3.bf16.msra.mxu1 %v2841_v51  ;;  %p2932_p0 = scmp.ne.s32.totalorder %s2294_s10, %s2931_s11  ;;  %p2937_p2 = scmp.lt.s32.totalorder %s2931_s11, %s2931_s11 }
0x1e70   :  { %2673 = vmatprep.subr.mxu1 %v2981_v11 }
0x1e71   :  { %p2938_p3 = por %p2937_p2, %p2936_p1 }
0x1e73   :  { %p2939_p4 = pnand %p2938_p3, %p2932_p0 }
0x1ecb   :  { %v1924_v17 = vpop.permute.xlu1 %1923 }
0x1ecc   :  { %v1930_v47 = vsel %vm1618_vm4, %v1761_v20, %v1924_v17 }
0x1f2d   :  { %v1917_v42 = vpop.f32.mrb[8].mxu0 }
0x1f2e   :  { %v1921_v43 = vmul.f32 2.0, %v1917_v42  ;;  %v2638_v44 = vpop.f32.mrb[9].mxu0 }
0x1f30   :  { %v1922_v45 = vsub.f32 %v1921_v43, %v1761_v20 }
0x1f32   :  { %1927 = vrot.lane.b32.xlu1 %v1922_v45, %s2987_s27 }
0x1fa4   :  { %v1928_v48 = vpop.permute.xlu1 %1927 }
0x1fa5   :  { %v1931_v49 = vsel %vm1094_vm6, %v1930_v47, %v1928_v48 }
0x1fa6   :  { %2664 = vmatmul.mubr.msk.f32.vlgmr.msra.gmra.mrb[10].mxu0 %vm1202_vm8, %v1931_v49 }
0x2079   :  { %v2005_v53 = vpop.f32.mrb[10].mxu0 }
0x207a   :  { %v2006_v54 = vadd.f32 %v2355_v52, %v2005_v53  ;;  %v2665_v55 = vpop.f32.mrb[11].mxu0 }
0x207c   :  { %v2009_v56 = vmax.f32 %v2006_v54, 0.0 }
0x207e   :  { %2671 = vmatmul.mubr.msk.f32.vlgmr.msra.gmra.mrb[30].mxu1 %vm141_vm0, %v2009_v56  ;;  %v2174_v2 = vmul.f32 %v2173_v1, %v2009_v56  ;;  %vm2252_vm0 = vcmask 125952  }
0x207f   :  { %2675 = vmatprep.mubr.msk.f32.mxu1 %vm2980_vm1, %v2981_v11  ;;  %2674 = vmatpush3.msra.mxu1 %v2091_v57 }
0x2080   :  { %2678 = vmatprep.subr.mxu1 %v2981_v11  ;;  %v2260_v36 = vmul.f32 %v2174_v2, %v2009_v56 }
0x2082   :  { %v2261_v3 = vsel %vm2252_vm0, %v2260_v36, 0.0 }
0x2083   :  { %v2262_v6 = vrot.slane %v2261_v3, 4 }
0x2085   :  { %v2263_v7 = vadd.f32 %v2262_v6, %v2261_v3 }
0x2087   :  { %v2264_v9 = vrot.slane %v2263_v7, 2 }
0x2089   :  { %v2265_v10 = vadd.f32 %v2264_v9, %v2263_v7 }
0x208b   :  { %v2266_v19 = vrot.slane %v2265_v10, 1 }
0x2151   :  { %v2086_v59 = vpop.f32.mrb[30].mxu1 }
0x2152   :  { %v2087_v60 = vadd.f32 %v2357_v58, %v2086_v59  ;;  %v2672_v61 = vpop.f32.mrb[31].mxu1 }
0x2154   :  { %v2090_v62 = vmax.f32 %v2087_v60, 0.0 }
0x2156   :  { %2676 = vmatmul.mubr.msk.f32.vlgmr.msra.gmra.mrb[32].mxu1 %vm1319_vm14, %v2090_v62 }
0x2157   :  { %2679 = vmatpush3.msk.msra.mxu1 %vm55_vm3, %v2009_v56  ;;  %2680 = vmatprep.mubr.msk.f32.mxu1 %vm2980_vm1, %v2981_v11  ;;  %vm2271_vm1 = vcmask 122880  }
0x215a   :  { %2681 = vmatmul.mubr.msk.f32.vlgmr.msra.gmra.mrb[34].mxu1 %vm1454_vm2, %v3362_v0  ;;  %v2267_v0 = vadd.f32 %v2266_v19, %v2265_v10 }
0x215c   :  { %v2268_v22 = vadd.f32 1e-08, %v2267_v0 }
0x215e   :  { %2929 = vrcp.f32 %v2268_v22 }
0x2168   :  { %v2930_v8 = vpop.eup %2929 }
0x2229   :  { %v2166_v11 = vpop.f32.mrb[32].mxu1 }
0x222a   :  { %v2167_v13 = vadd.f32 %v2359_v12, %v2166_v11  ;;  %v2677_v46 = vpop.f32.mrb[33].mxu1 }
0x222c   :  { %2170 = vst [vmem:[#allocation2] sm:$0xf] %v2167_v13 }
0x222d   :  { %v2246_v15 = vpop.f32.mrb[34].mxu1 }
0x222e   :  { %v2250_v16 = vsub.f32 %v2174_v2, %v2246_v15  ;;  %v2682_v18 = vpop.f32.mrb[35].mxu1 }
0x2230   :  { %v2251_v21 = vmul.f32 %v2250_v16, %v2009_v56 }
0x2232   :  { %v2253_v23 = vsel %vm2252_vm0, %v2251_v21, 0.0 }
0x2233   :  { %v2254_v20 = vrot.slane %v2253_v23, 4 }
0x2235   :  { %v2255_v24 = vadd.f32 %v2254_v20, %v2253_v23 }
0x2237   :  { %v2256_v25 = vrot.slane %v2255_v24, 2 }
0x2239   :  { %v2257_v26 = vadd.f32 %v2256_v25, %v2255_v24 }
0x223b   :  { %v2258_v27 = vrot.slane %v2257_v26, 1 }
0x223d   :  { %v2259_v28 = vadd.f32 %v2258_v27, %v2257_v26 }
0x223f   :  { %v2270_v4 = vmul.f32 %v2930_v8, %v2259_v28 }
0x2241   :  { %v2272_v29 = vsel %vm2271_vm1, %v2270_v4, 0.0 }
0x2242   :  { %2273 = vadd.xlane.f32.xlu1 %v2272_v29 }
0x2243   :  { %2942 = shalt.err (!%p2939_p4)
}
0x2244   :  { %s2943_s14 = scalar_lea.hbm %s3616_s3, 64 }
0x2245   :  { %p2944_p5 = scmp.ne.s32.totalorder %s3616_s3, %s2943_s14  ;;  %p2947_p6 = scmp.lt.u32.totalorder %s2943_s14, %s3616_s3 }
0x2247   :  { %p2949_p7 = pnand %p2947_p6, %p2944_p5 }
0x2249   :  { %2952 = shalt.err (!%p2949_p7)
}
0x224a   :  { %2296 = dma.vmem_to_hbm [thread:$0]  %s2294_s10, 64, %s3616_s3, [#allocation3]  }
0x224b   :  { %s2989_s20 = smov [#allocation4]  }
0x224c   :  { %s2303_s22 = sshll.u32 %s2989_s20, 4  ;;  %s2304_s22 = int_to_ptr.vmem [resolvable:$true] %s2303_s22 }
0x224d   :  { %s2953_s25 = scalar_lea.vmem %s2304_s22, 16  ;;  %s2957_s26 = scalar_lea.vmem %s2304_s22, 32 }
0x224e   :  { %p2954_p8 = scmp.ne.s32.totalorder %s2304_s22, %s2953_s25  ;;  %p2958_p9 = scmp.lt.s32.totalorder %s2304_s22, %s2304_s22 }
0x224f   :  { %p2959_p10 = scmp.lt.s32.totalorder %s2957_s26, %s2953_s25 }
0x2251   :  { %p2960_p11 = por %p2959_p10, %p2958_p9 }
0x2253   :  { %p2961_p12 = pnand %p2960_p11, %p2954_p8 }
0x22cf   :  { %v2274_v30 = vpop.xlane.xlu1 %2273 }
0x22d0   :  { %v2275_v31 = vrot.slane %v2274_v30, 4 }
0x22d2   :  { %v2276_v32 = vadd.f32 %v2275_v31, %v2274_v30 }
0x22d4   :  { %v2277_v34 = vrot.slane %v2276_v32, 2 }
0x22d6   :  { %v2278_v14 = vadd.f32 %v2277_v34, %v2276_v32 }
0x22d8   :  { %v2279_v35 = vrot.slane %v2278_v14, 1 }
0x22da   :  { %v2280_v37 = vadd.f32 %v2279_v35, %v2278_v14 }
0x22dc   :  { %2843 = vpush %v2280_v37 }
0x230d   :  { %s2844_s23 = spop %2843 }
0x230e   :  { %s2284_s24 = smul.f32 0.0625, %s2844_s23 }
0x2310   :  { %v2285_v33 = vstv %s2284_s24 }
0x2311   :  { %2286 = vst [vmem:[#allocation4] sm:$0x1] %v2285_v33 }
0x2312   :  { %2964 = shalt.err (!%p2961_p12)
}
0x2313   :  { %s2965_s29 = scalar_lea.hbm %s3617_s4, 16 }
0x2314   :  { %p2966_p13 = scmp.ne.s32.totalorder %s3617_s4, %s2965_s29  ;;  %p2969_p0 = scmp.lt.u32.totalorder %s2965_s29, %s3617_s4 }
0x2316   :  { %p2971_p1 = pnand %p2969_p0, %p2966_p13 }
0x2318   :  { %2974 = shalt.err (!%p2971_p1)
}
0x2319   :  { %2306 = dma.vmem_to_hbm [thread:$0]  %s2304_s22, 16, %s3617_s4, [#allocation5]  }
0x231a   :  { %2975 = dma.done.wait [#allocation3], 64  }
0x231b   :  { %2976 = vsyncadd [#allocation3], 4294967232 }
0x231c   :  { %2977 = dma.done.wait [#allocation5], 16  }
0x231d   :  { %2978 = vsyncadd [#allocation5], 4294967280 }
0x231e   :  { %2313 = vsyncpa [#allocation3], 1 }
0x231f   :  { %2314 = vsyncpa [#allocation5], 1 }

</bundles_post_ra>
